<compile_context>
chip_gen: v6e
topology: v6e:2x2x1
jax: 0.10.0
libtpu: 0.0.40
codegen_flags: <defaults>
</compile_context>

<pallas_src>
import functools

import jax
import jax.numpy as jnp
from jax.experimental import pallas as pl
from jax.experimental.pallas import tpu as pltpu

# ---------------- synthetic config (small, consistent with the module) -------
B, C, T, H, W = 2, 3, 4, 16, 16        # video input: (B, C, T, H, W)
PATCH = 8
TUBELET = 1
DIM = 32                               # num_features
DEPTH = 2
HEADS = 4
HEAD_DIM = DIM // HEADS
MLP_DIM = 4 * DIM
MASK_RATIO = 0.5
MASK_STRIDE = (1, 1, 1)
LN_EPS = 1e-6

PH, PW = H // PATCH, W // PATCH
PT = T // TUBELET
L = PT * PH * PW                       # number of tokens
K = C * PATCH * PATCH                  # flattened patch dim (c, i, j) == Conv3d weight order
N_KEEP = (int((L // (MASK_STRIDE[0] * MASK_STRIDE[1] * MASK_STRIDE[2])) * (1 - MASK_RATIO))
          * MASK_STRIDE[0] * MASK_STRIDE[1] * MASK_STRIDE[2])


# ---------------- fused Pallas kernel ----------------
def _layernorm(x, g, b, eps):
    mu = jnp.mean(x, axis=-1, keepdims=True)
    var = jnp.mean(jnp.square(x - mu), axis=-1, keepdims=True)
    return (x - mu) * jax.lax.rsqrt(var + eps) * g + b


def _fused_forward_kernel(
        patches_ref, sel_ref, pos_ref, hm_ref, seg_ref,
        pw_ref, pb_ref,
        ln1g_ref, ln1b_ref, wqkv_ref, bqkv_ref, wo_ref, bo_ref,
        ln2g_ref, ln2b_ref, w1_ref, b1_ref, w2_ref, b2_ref,
        fng_ref, fnb_ref, o_ref,
        *, n_keep, depth, n_heads, head_dim, eps):
    f32 = jnp.float32
    bf16 = jnp.bfloat16
    d_model = n_heads * head_dim
    scale = 1.0 / float(head_dim) ** 0.5

    # ---- stem: Conv3d([1,P,P]) for this batch sample as (L,K)@(K,D), bf16 ops / f32 acc ----
    tok = jnp.dot(patches_ref[...].astype(bf16), pw_ref[...],
                  preferred_element_type=f32)
    tok = tok + pb_ref[...] + pos_ref[...]                       # (L, D) f32

    # ---- learning_masking token gather: exact one-hot matmul (f32, VMEM-resident) ----
    x = jnp.dot(sel_ref[...], tok, preferred_element_type=f32)   # (Nk, D)

    head_mask = hm_ref[...]   # (H*Nk, D): 1 where lane d belongs to the row's head, else 0
    seg_mat = seg_ref[...]    # (H*Nk, H*Nk): block-diag ones -> per-head segment sums

    # ---- DEPTH pre-norm transformer blocks (static unroll, weights VMEM-resident) ----
    # TODO(synk): BRANCH_REGISTRY block code is not provided; a standard pre-norm
    # ViT block (MHSA + 4x GELU MLP, dropout/drop_path = identity in eval) is used.
    for l in range(depth):
        # --- multi-head self-attention: ONE score matmul + ONE PV matmul, lane-dense ---
        xn = _layernorm(x, ln1g_ref[l], ln1b_ref[l], eps)
        qkv = jnp.dot(xn.astype(bf16), wqkv_ref[l],
                      preferred_element_type=f32) + bqkv_ref[l]  # (Nk, 3D)
        q = qkv[:, 0:d_model]
        k = qkv[:, d_model:2 * d_model]
        v = qkv[:, 2 * d_model:3 * d_model]
        # head-replicate K / V along sublanes (cheap concat), zero off-head lanes
        k_rep = (jnp.concatenate([k] * n_heads, axis=0) * head_mask).astype(bf16)  # (H*Nk, D)
        v_rep = (jnp.concatenate([v] * n_heads, axis=0) * head_mask).astype(bf16)  # (H*Nk, D)
        # scores laid out lane-dense: (Nk, H*Nk); column block h holds head h's keys
        s = jax.lax.dot_general(q.astype(bf16), k_rep, (((1,), (1,)), ((), ())),
                                preferred_element_type=f32) * scale
        # row-global max is a valid softmax shift for every head segment
        s = s - jnp.max(s, axis=-1, keepdims=True)
        p = jnp.exp(s)
        denom = jnp.dot(p, seg_mat, preferred_element_type=f32)   # per-head segment sums
        p = p * pl.reciprocal(denom, approx=True)
        # PV: head lanes of v_rep are disjoint -> result is already the head-concat ctx
        ctx = jnp.dot(p.astype(bf16), v_rep, preferred_element_type=f32)           # (Nk, D)
        attn = jnp.dot(ctx.astype(bf16), wo_ref[l],
                       preferred_element_type=f32) + bo_ref[l]
        x = x + attn
        # --- MLP ---
        hn = _layernorm(x, ln2g_ref[l], ln2b_ref[l], eps)
        m = jnp.dot(hn.astype(bf16), w1_ref[l], preferred_element_type=f32) + b1_ref[l]
        # TODO(synk): PyTorch nn.GELU is exact-erf; tanh approximation used for TPU lowering.
        m = jax.nn.gelu(m, approximate=True)
        m = jnp.dot(m.astype(bf16), w2_ref[l], preferred_element_type=f32) + b2_ref[l]
        x = x + m

    # ---- final LayerNorm(eps=1e-6) + mean over kept tokens for this batch sample ----
    y = _layernorm(x, fng_ref[...], fnb_ref[...], eps)
    o_ref[...] = jnp.mean(y, axis=0, keepdims=True).astype(o_ref.dtype)


def _const_spec(arr):
    # Whole array, same block every grid step -> Pallas keeps it VMEM-resident (no re-DMA).
    if arr.ndim == 2:
        return pl.BlockSpec(arr.shape, lambda b: (0, 0))
    return pl.BlockSpec(arr.shape, lambda b: (0, 0, 0))


def fused_forward_pallas(patches, sel, pos, head_mask, seg_mat, p, *, batch, n_keep):
    kernel = functools.partial(
        _fused_forward_kernel, n_keep=n_keep, depth=DEPTH,
        n_heads=HEADS, head_dim=HEAD_DIM, eps=LN_EPS)

    weight_args = (p['patch_w'], p['patch_b'],
                   p['ln1_g'], p['ln1_b'], p['w_qkv'], p['b_qkv'], p['w_o'], p['b_o'],
                   p['ln2_g'], p['ln2_b'], p['w_mlp1'], p['b_mlp1'],
                   p['w_mlp2'], p['b_mlp2'], p['norm_g'], p['norm_b'])

    in_specs = [
        pl.BlockSpec((None, L, K), lambda b: (b, 0, 0)),        # per-batch patches
        pl.BlockSpec((None, n_keep, L), lambda b: (b, 0, 0)),   # per-batch one-hot gather
        _const_spec(pos), _const_spec(head_mask), _const_spec(seg_mat),
    ] + [_const_spec(w) for w in weight_args]

    out = pl.pallas_call(
        kernel,
        out_shape=jax.ShapeDtypeStruct((batch, 1, DIM), jnp.float32),
        grid_spec=pltpu.PrefetchScalarGridSpec(
            num_scalar_prefetch=0,
            grid=(batch,),
            in_specs=in_specs,
            out_specs=pl.BlockSpec((None, 1, DIM), lambda b: (b, 0, 0)),
        ),
        # Batch-parallel grid: ~2x on v7x (2 TCs); a short (<1 us) serial loop on
        # v5e/v6e.  Problem is a few hundred KB -> default VMEM budget is plenty.
        compiler_params=pltpu.CompilerParams(
            dimension_semantics=("parallel",)),
    )(patches, sel, pos, head_mask, seg_mat, *weight_args)
    return out.reshape(batch, DIM)


# ---------------- JAX glue: masking RNG / argsort (data-dependent, host side) -
def random_masking_stride(key, n, l, mask_ratio, patches_shape, mask_stride):
    ls = l // (mask_stride[0] * mask_stride[1] * mask_stride[2])
    len_keep = int(ls * (1 - mask_ratio))
    noise = jax.random.uniform(key, (n, ls), dtype=jnp.float32)
    ids_shuffle = jnp.argsort(noise, axis=1)
    ids_restore = jnp.argsort(ids_shuffle, axis=1)
    mask = jnp.ones((n, ls), jnp.float32).at[:, :len_keep].set(0.0)
    mask = jnp.take_along_axis(mask, ids_restore, axis=1)
    mask = 1.0 - mask
    mask = mask.reshape(n, patches_shape[0] // mask_stride[0],
                        patches_shape[1] // mask_stride[1],
                        patches_shape[2] // mask_stride[2])
    mask = jnp.repeat(mask, mask_stride[0], axis=1)
    mask = jnp.repeat(mask, mask_stride[1], axis=2)
    mask = jnp.repeat(mask, mask_stride[2], axis=3)
    return mask, len_keep * mask_stride[0] * mask_stride[1] * mask_stride[2]


# ---------------- params + shape-static attention constants ----------------
def init_params(key):
    ks = jax.random.split(key, 6)
    bf16 = jnp.bfloat16
    # Conv3d(dim, C, [1,P,P]) weight, pre-reshaped once into matmul form (K, D), bf16.
    conv_w = jax.random.normal(ks[0], (DIM, C, 1, PATCH, PATCH), jnp.float32) * 0.02

    rows = jnp.arange(HEADS * N_KEEP, dtype=jnp.int32)
    head_of_row = rows // N_KEEP
    head_mask = (head_of_row[:, None] ==
                 (jnp.arange(DIM, dtype=jnp.int32) // HEAD_DIM)[None, :]).astype(jnp.float32)
    seg_mat = (head_of_row[:, None] == head_of_row[None, :]).astype(jnp.float32)

    params = {
        'patch_w': conv_w.reshape(DIM, K).T.astype(bf16),                     # (K, D)
        'patch_b': jnp.zeros((1, DIM), jnp.float32),
        'pos_embed': jax.random.normal(ks[1], (L, DIM), jnp.float32) * 1e-5,  # learnable
        'norm_g': jnp.ones((1, DIM), jnp.float32),
        'norm_b': jnp.zeros((1, DIM), jnp.float32),
        # per-layer weights pre-stacked along a DEPTH leading axis; matmul weights bf16
        'ln1_g': jnp.ones((DEPTH, 1, DIM), jnp.float32),
        'ln1_b': jnp.zeros((DEPTH, 1, DIM), jnp.float32),
        'w_qkv': (jax.random.normal(ks[2], (DEPTH, DIM, 3 * DIM), jnp.float32) * 0.02).astype(bf16),
        'b_qkv': jnp.zeros((DEPTH, 1, 3 * DIM), jnp.float32),
        'w_o': (jax.random.normal(ks[3], (DEPTH, DIM, DIM), jnp.float32) * 0.02).astype(bf16),
        'b_o': jnp.zeros((DEPTH, 1, DIM), jnp.float32),
        'ln2_g': jnp.ones((DEPTH, 1, DIM), jnp.float32),
        'ln2_b': jnp.zeros((DEPTH, 1, DIM), jnp.float32),
        'w_mlp1': (jax.random.normal(ks[4], (DEPTH, DIM, MLP_DIM), jnp.float32) * 0.02).astype(bf16),
        'b_mlp1': jnp.zeros((DEPTH, 1, MLP_DIM), jnp.float32),
        'w_mlp2': (jax.random.normal(ks[5], (DEPTH, MLP_DIM, DIM), jnp.float32) * 0.02).astype(bf16),
        'b_mlp2': jnp.zeros((DEPTH, 1, DIM), jnp.float32),
        # shape-static attention constants (precomputed once, passed as VMEM inputs)
        'attn_head_mask': head_mask,                              # (H*Nk, D)
        'attn_seg_mat': seg_mat,                                  # (H*Nk, H*Nk)
    }
    return params


# ---------------- forward ----------------
@jax.jit
def forward(params, x_video, mask_key):
    Bb = x_video.shape[0]
    # Patchify: pure layout (Conv3d [1,P,P]/stride[1,P,P] becomes a matmul in-kernel).
    xp = x_video.reshape(Bb, C, T, PH, PATCH, PW, PATCH)
    xp = xp.transpose(0, 2, 3, 5, 1, 4, 6).reshape(Bb, L, K)        # rows per batch: (t, ph, pw)

    # random_masking_stride + learning_masking index computation (RNG / argsort in XLA).
    mask, len_keep = random_masking_stride(mask_key, Bb, L, MASK_RATIO,
                                           (PT, PH, PW), MASK_STRIDE)
    # stable argsort of (1 - mask) == torch.nonzero ordering: kept-ascending first.
    ids_shuffle = jnp.argsort(1.0 - mask.reshape(Bb, -1), axis=1, stable=True)
    ids_keep = ids_shuffle[:, :len_keep].astype(jnp.int32)          # (B, N_keep)
    # One-hot gather matrix (B, N_keep, L), consumed as an exact f32 matmul in-kernel.
    sel = (ids_keep[:, :, None] ==
           jnp.arange(L, dtype=jnp.int32)[None, None, :]).astype(jnp.float32)
    # TODO(synk): if L / N_keep ever scale up, replace the one-hot gather with a
    # scalar-prefetch (ids_keep in SMEM) row gather to avoid the O(N_keep*L) matrix.

    # Single fused Pallas kernel: stem + gather + DEPTH blocks + final norm/mean.
    return fused_forward_pallas(xp, sel, params['pos_embed'],
                                params['attn_head_mask'], params['attn_seg_mat'],
                                params, batch=Bb, n_keep=len_keep)


if __name__ == "__main__":
    root = jax.random.PRNGKey(0)
    k_param, k_data, k_mask = jax.random.split(root, 3)
    params = init_params(k_param)
    x = jax.random.normal(k_data, (B, C, T, H, W), jnp.float32)
    out = forward(params, x, k_mask)
    out = jax.block_until_ready(out)
    assert out.shape == (B, DIM)
    assert bool(jnp.all(jnp.isfinite(out)))
    print("KERNEL_OK")
</pallas_src>

<mosaic_0001>
module attributes {stable_mosaic.version = 11 : i64} {
  func.func @_fused_forward_kernel(%arg0: i32, %arg1: memref<1x16x192xf32, #tpu.memory_space<vmem>>, %arg2: memref<1x8x16xf32, #tpu.memory_space<vmem>>, %arg3: memref<16x32xf32, #tpu.memory_space<vmem>>, %arg4: memref<32x32xf32, #tpu.memory_space<vmem>>, %arg5: memref<32x32xf32, #tpu.memory_space<vmem>>, %arg6: memref<192x32xbf16, #tpu.memory_space<vmem>>, %arg7: memref<1x32xf32, #tpu.memory_space<vmem>>, %arg8: memref<2x1x32xf32, #tpu.memory_space<vmem>>, %arg9: memref<2x1x32xf32, #tpu.memory_space<vmem>>, %arg10: memref<2x32x96xbf16, #tpu.memory_space<vmem>>, %arg11: memref<2x1x96xf32, #tpu.memory_space<vmem>>, %arg12: memref<2x32x32xbf16, #tpu.memory_space<vmem>>, %arg13: memref<2x1x32xf32, #tpu.memory_space<vmem>>, %arg14: memref<2x1x32xf32, #tpu.memory_space<vmem>>, %arg15: memref<2x1x32xf32, #tpu.memory_space<vmem>>, %arg16: memref<2x32x128xbf16, #tpu.memory_space<vmem>>, %arg17: memref<2x1x128xf32, #tpu.memory_space<vmem>>, %arg18: memref<2x128x32xbf16, #tpu.memory_space<vmem>>, %arg19: memref<2x1x32xf32, #tpu.memory_space<vmem>>, %arg20: memref<1x32xf32, #tpu.memory_space<vmem>>, %arg21: memref<1x32xf32, #tpu.memory_space<vmem>>, %arg22: memref<1x1x32xf32, #tpu.memory_space<vmem>>) attributes {dimension_semantics = [#tpu.dimension_semantics<parallel>], iteration_bounds = array<i64: 2>, scalar_prefetch = 0 : i64, scratch_operands = 0 : i64, tpu.core_type = #tpu.core_type<tc>, window_params = [{transform_indices = @transform_0, window_bounds = array<i64: 1, 16, 192>}, {transform_indices = @transform_1, window_bounds = array<i64: 1, 8, 16>}, {pipeline_mode = #tpu.pipeline_mode<synchronous>, transform_indices = @transform_2, window_bounds = array<i64: 16, 32>}, {pipeline_mode = #tpu.pipeline_mode<synchronous>, transform_indices = @transform_3, window_bounds = array<i64: 32, 32>}, {pipeline_mode = #tpu.pipeline_mode<synchronous>, transform_indices = @transform_4, window_bounds = array<i64: 32, 32>}, {pipeline_mode = #tpu.pipeline_mode<synchronous>, transform_indices = @transform_5, window_bounds = array<i64: 192, 32>}, {pipeline_mode = #tpu.pipeline_mode<synchronous>, transform_indices = @transform_6, window_bounds = array<i64: 1, 32>}, {pipeline_mode = #tpu.pipeline_mode<synchronous>, transform_indices = @transform_7, window_bounds = array<i64: 2, 1, 32>}, {pipeline_mode = #tpu.pipeline_mode<synchronous>, transform_indices = @transform_8, window_bounds = array<i64: 2, 1, 32>}, {pipeline_mode = #tpu.pipeline_mode<synchronous>, transform_indices = @transform_9, window_bounds = array<i64: 2, 32, 96>}, {pipeline_mode = #tpu.pipeline_mode<synchronous>, transform_indices = @transform_10, window_bounds = array<i64: 2, 1, 96>}, {pipeline_mode = #tpu.pipeline_mode<synchronous>, transform_indices = @transform_11, window_bounds = array<i64: 2, 32, 32>}, {pipeline_mode = #tpu.pipeline_mode<synchronous>, transform_indices = @transform_12, window_bounds = array<i64: 2, 1, 32>}, {pipeline_mode = #tpu.pipeline_mode<synchronous>, transform_indices = @transform_13, window_bounds = array<i64: 2, 1, 32>}, {pipeline_mode = #tpu.pipeline_mode<synchronous>, transform_indices = @transform_14, window_bounds = array<i64: 2, 1, 32>}, {pipeline_mode = #tpu.pipeline_mode<synchronous>, transform_indices = @transform_15, window_bounds = array<i64: 2, 32, 128>}, {pipeline_mode = #tpu.pipeline_mode<synchronous>, transform_indices = @transform_16, window_bounds = array<i64: 2, 1, 128>}, {pipeline_mode = #tpu.pipeline_mode<synchronous>, transform_indices = @transform_17, window_bounds = array<i64: 2, 128, 32>}, {pipeline_mode = #tpu.pipeline_mode<synchronous>, transform_indices = @transform_18, window_bounds = array<i64: 2, 1, 32>}, {pipeline_mode = #tpu.pipeline_mode<synchronous>, transform_indices = @transform_19, window_bounds = array<i64: 1, 32>}, {pipeline_mode = #tpu.pipeline_mode<synchronous>, transform_indices = @transform_20, window_bounds = array<i64: 1, 32>}, {transform_indices = @transform_21, window_bounds = array<i64: 1, 1, 32>}]} {
    %c0 = arith.constant 0 : index
    %c0_0 = arith.constant 0 : index
    %c0_1 = arith.constant 0 : index
    %0 = vector.load %arg1[%c0, %c0_0, %c0_1] : memref<1x16x192xf32, #tpu.memory_space<vmem>>, vector<1x16x192xf32>
    %1 = vector.shape_cast %0 : vector<1x16x192xf32> to vector<16x192xf32>
    %2 = arith.truncf %1 : vector<16x192xf32> to vector<16x192xbf16>
    %c0_2 = arith.constant 0 : index
    %c0_3 = arith.constant 0 : index
    %3 = vector.load %arg6[%c0_2, %c0_3] : memref<192x32xbf16, #tpu.memory_space<vmem>>, vector<192x32xbf16>
    %cst = arith.constant dense<0.000000e+00> : vector<16x32xf32>
    %4 = tpu.matmul %2, %3, %cst {dimension_numbers = #tpu.dot_dimension_numbers<[1], [0], [0], [1], [0, 0, 1, 1], [], []>} : vector<16x192xbf16>, vector<192x32xbf16>, vector<16x32xf32> -> vector<16x32xf32>
    %c0_4 = arith.constant 0 : index
    %c0_5 = arith.constant 0 : index
    %5 = vector.load %arg7[%c0_4, %c0_5] : memref<1x32xf32, #tpu.memory_space<vmem>>, vector<1x32xf32>
    %6 = vector.broadcast %5 : vector<1x32xf32> to vector<16x32xf32>
    %7 = arith.addf %4, %6 : vector<16x32xf32>
    %c0_6 = arith.constant 0 : index
    %c0_7 = arith.constant 0 : index
    %8 = vector.load %arg3[%c0_6, %c0_7] : memref<16x32xf32, #tpu.memory_space<vmem>>, vector<16x32xf32>
    %9 = arith.addf %7, %8 : vector<16x32xf32>
    %c0_8 = arith.constant 0 : index
    %c0_9 = arith.constant 0 : index
    %c0_10 = arith.constant 0 : index
    %10 = vector.load %arg2[%c0_8, %c0_9, %c0_10] : memref<1x8x16xf32, #tpu.memory_space<vmem>>, vector<1x8x16xf32>
    %11 = vector.shape_cast %10 : vector<1x8x16xf32> to vector<8x16xf32>
    %cst_11 = arith.constant dense<0.000000e+00> : vector<8x32xf32>
    %12 = tpu.matmul %11, %9, %cst_11 {dimension_numbers = #tpu.dot_dimension_numbers<[1], [0], [0], [1], [0, 0, 1, 1], [], []>} : vector<8x16xf32>, vector<16x32xf32>, vector<8x32xf32> -> vector<8x32xf32>
    %c0_12 = arith.constant 0 : index
    %c0_13 = arith.constant 0 : index
    %13 = vector.load %arg4[%c0_12, %c0_13] : memref<32x32xf32, #tpu.memory_space<vmem>>, vector<32x32xf32>
    %c0_14 = arith.constant 0 : index
    %c0_15 = arith.constant 0 : index
    %14 = vector.load %arg5[%c0_14, %c0_15] : memref<32x32xf32, #tpu.memory_space<vmem>>, vector<32x32xf32>
    %c0_16 = arith.constant 0 : index
    %c0_17 = arith.constant 0 : index
    %c0_18 = arith.constant 0 : index
    %15 = vector.load %arg8[%c0_16, %c0_17, %c0_18] : memref<2x1x32xf32, #tpu.memory_space<vmem>>, vector<1x1x32xf32>
    %16 = vector.shape_cast %15 : vector<1x1x32xf32> to vector<1x32xf32>
    %c0_19 = arith.constant 0 : index
    %c0_20 = arith.constant 0 : index
    %c0_21 = arith.constant 0 : index
    %17 = vector.load %arg9[%c0_19, %c0_20, %c0_21] : memref<2x1x32xf32, #tpu.memory_space<vmem>>, vector<1x1x32xf32>
    %18 = vector.shape_cast %17 : vector<1x1x32xf32> to vector<1x32xf32>
    %cst_22 = arith.constant dense<0.000000e+00> : vector<8xf32>
    %19 = vector.multi_reduction <add>, %12, %cst_22 [1] : vector<8x32xf32> to vector<8xf32>
    %20 = vector.shape_cast %19 : vector<8xf32> to vector<8x1xf32>
    %cst_23 = arith.constant 3.200000e+01 : f32
    %21 = vector.broadcast %cst_23 : f32 to vector<8x1xf32>
    %22 = arith.divf %20, %21 : vector<8x1xf32>
    %23 = vector.broadcast %22 : vector<8x1xf32> to vector<8x32xf32>
    %24 = arith.subf %12, %23 : vector<8x32xf32>
    %25 = arith.mulf %24, %24 : vector<8x32xf32>
    %cst_24 = arith.constant dense<0.000000e+00> : vector<8xf32>
    %26 = vector.multi_reduction <add>, %25, %cst_24 [1] : vector<8x32xf32> to vector<8xf32>
    %27 = vector.shape_cast %26 : vector<8xf32> to vector<8x1xf32>
    %cst_25 = arith.constant 3.200000e+01 : f32
    %28 = vector.broadcast %cst_25 : f32 to vector<8x1xf32>
    %29 = arith.divf %27, %28 : vector<8x1xf32>
    %30 = vector.broadcast %22 : vector<8x1xf32> to vector<8x32xf32>
    %31 = arith.subf %12, %30 : vector<8x32xf32>
    %cst_26 = arith.constant 9.99999997E-7 : f32
    %32 = vector.broadcast %cst_26 : f32 to vector<8x1xf32>
    %33 = arith.addf %29, %32 : vector<8x1xf32>
    %34 = math.rsqrt %33 : vector<8x1xf32>
    %35 = vector.broadcast %34 : vector<8x1xf32> to vector<8x32xf32>
    %36 = arith.mulf %31, %35 : vector<8x32xf32>
    %37 = vector.broadcast %16 : vector<1x32xf32> to vector<8x32xf32>
    %38 = arith.mulf %36, %37 : vector<8x32xf32>
    %39 = vector.broadcast %18 : vector<1x32xf32> to vector<8x32xf32>
    %40 = arith.addf %38, %39 : vector<8x32xf32>
    %41 = arith.truncf %40 : vector<8x32xf32> to vector<8x32xbf16>
    %c0_27 = arith.constant 0 : index
    %c0_28 = arith.constant 0 : index
    %c0_29 = arith.constant 0 : index
    %42 = vector.load %arg10[%c0_27, %c0_28, %c0_29] : memref<2x32x96xbf16, #tpu.memory_space<vmem>>, vector<1x32x96xbf16>
    %43 = vector.shape_cast %42 : vector<1x32x96xbf16> to vector<32x96xbf16>
    %cst_30 = arith.constant dense<0.000000e+00> : vector<8x96xf32>
    %44 = tpu.matmul %41, %43, %cst_30 {dimension_numbers = #tpu.dot_dimension_numbers<[1], [0], [0], [1], [0, 0, 1, 1], [], []>} : vector<8x32xbf16>, vector<32x96xbf16>, vector<8x96xf32> -> vector<8x96xf32>
    %c0_31 = arith.constant 0 : index
    %c0_32 = arith.constant 0 : index
    %c0_33 = arith.constant 0 : index
    %45 = vector.load %arg11[%c0_31, %c0_32, %c0_33] : memref<2x1x96xf32, #tpu.memory_space<vmem>>, vector<1x1x96xf32>
    %46 = vector.shape_cast %45 : vector<1x1x96xf32> to vector<1x96xf32>
    %47 = vector.broadcast %46 : vector<1x96xf32> to vector<8x96xf32>
    %48 = arith.addf %44, %47 : vector<8x96xf32>
    %49 = vector.extract_strided_slice %48 {offsets = [0, 0], sizes = [8, 32], strides = [1, 1]} : vector<8x96xf32> to vector<8x32xf32>
    %50 = vector.extract_strided_slice %48 {offsets = [0, 32], sizes = [8, 32], strides = [1, 1]} : vector<8x96xf32> to vector<8x32xf32>
    %51 = vector.extract_strided_slice %48 {offsets = [0, 64], sizes = [8, 32], strides = [1, 1]} : vector<8x96xf32> to vector<8x32xf32>
    %52 = tpu.concatenate %50, %50, %50, %50 in 0 : vector<8x32xf32>, vector<8x32xf32>, vector<8x32xf32>, vector<8x32xf32> -> vector<32x32xf32>
    %53 = arith.mulf %52, %13 : vector<32x32xf32>
    %54 = arith.truncf %53 : vector<32x32xf32> to vector<32x32xbf16>
    %55 = tpu.concatenate %51, %51, %51, %51 in 0 : vector<8x32xf32>, vector<8x32xf32>, vector<8x32xf32>, vector<8x32xf32> -> vector<32x32xf32>
    %56 = arith.mulf %55, %13 : vector<32x32xf32>
    %57 = arith.truncf %56 : vector<32x32xf32> to vector<32x32xbf16>
    %58 = arith.truncf %49 : vector<8x32xf32> to vector<8x32xbf16>
    %cst_34 = arith.constant dense<0.000000e+00> : vector<8x32xf32>
    %59 = tpu.matmul %58, %54, %cst_34 {dimension_numbers = #tpu.dot_dimension_numbers<[1], [1], [0], [0], [0, 0, 1, 0], [], []>} : vector<8x32xbf16>, vector<32x32xbf16>, vector<8x32xf32> -> vector<8x32xf32>
    %cst_35 = arith.constant 0.353553385 : f32
    %60 = vector.broadcast %cst_35 : f32 to vector<8x32xf32>
    %61 = arith.mulf %59, %60 : vector<8x32xf32>
    %cst_36 = arith.constant dense<0xFF800000> : vector<8xf32>
    %62 = vector.multi_reduction <maximumf>, %61, %cst_36 [1] : vector<8x32xf32> to vector<8xf32>
    %63 = vector.shape_cast %62 : vector<8xf32> to vector<8x1xf32>
    %64 = vector.broadcast %63 : vector<8x1xf32> to vector<8x32xf32>
    %65 = arith.subf %61, %64 : vector<8x32xf32>
    %66 = math.exp %65 : vector<8x32xf32>
    %cst_37 = arith.constant dense<0.000000e+00> : vector<8x32xf32>
    %67 = tpu.matmul %66, %14, %cst_37 {dimension_numbers = #tpu.dot_dimension_numbers<[1], [0], [0], [1], [0, 0, 1, 1], [], []>} : vector<8x32xf32>, vector<32x32xf32>, vector<8x32xf32> -> vector<8x32xf32>
    %68 = tpu.reciprocal %67 {approx = true} : vector<8x32xf32> -> vector<8x32xf32>
    %69 = arith.mulf %66, %68 : vector<8x32xf32>
    %70 = arith.truncf %69 : vector<8x32xf32> to vector<8x32xbf16>
    %cst_38 = arith.constant dense<0.000000e+00> : vector<8x32xf32>
    %71 = tpu.matmul %70, %57, %cst_38 {dimension_numbers = #tpu.dot_dimension_numbers<[1], [0], [0], [1], [0, 0, 1, 1], [], []>} : vector<8x32xbf16>, vector<32x32xbf16>, vector<8x32xf32> -> vector<8x32xf32>
    %72 = arith.truncf %71 : vector<8x32xf32> to vector<8x32xbf16>
    %c0_39 = arith.constant 0 : index
    %c0_40 = arith.constant 0 : index
    %c0_41 = arith.constant 0 : index
    %73 = vector.load %arg12[%c0_39, %c0_40, %c0_41] : memref<2x32x32xbf16, #tpu.memory_space<vmem>>, vector<1x32x32xbf16>
    %74 = vector.shape_cast %73 : vector<1x32x32xbf16> to vector<32x32xbf16>
    %cst_42 = arith.constant dense<0.000000e+00> : vector<8x32xf32>
    %75 = tpu.matmul %72, %74, %cst_42 {dimension_numbers = #tpu.dot_dimension_numbers<[1], [0], [0], [1], [0, 0, 1, 1], [], []>} : vector<8x32xbf16>, vector<32x32xbf16>, vector<8x32xf32> -> vector<8x32xf32>
    %c0_43 = arith.constant 0 : index
    %c0_44 = arith.constant 0 : index
    %c0_45 = arith.constant 0 : index
    %76 = vector.load %arg13[%c0_43, %c0_44, %c0_45] : memref<2x1x32xf32, #tpu.memory_space<vmem>>, vector<1x1x32xf32>
    %77 = vector.shape_cast %76 : vector<1x1x32xf32> to vector<1x32xf32>
    %78 = vector.broadcast %77 : vector<1x32xf32> to vector<8x32xf32>
    %79 = arith.addf %75, %78 : vector<8x32xf32>
    %80 = arith.addf %12, %79 : vector<8x32xf32>
    %c0_46 = arith.constant 0 : index
    %c0_47 = arith.constant 0 : index
    %c0_48 = arith.constant 0 : index
    %81 = vector.load %arg14[%c0_46, %c0_47, %c0_48] : memref<2x1x32xf32, #tpu.memory_space<vmem>>, vector<1x1x32xf32>
    %82 = vector.shape_cast %81 : vector<1x1x32xf32> to vector<1x32xf32>
    %c0_49 = arith.constant 0 : index
    %c0_50 = arith.constant 0 : index
    %c0_51 = arith.constant 0 : index
    %83 = vector.load %arg15[%c0_49, %c0_50, %c0_51] : memref<2x1x32xf32, #tpu.memory_space<vmem>>, vector<1x1x32xf32>
    %84 = vector.shape_cast %83 : vector<1x1x32xf32> to vector<1x32xf32>
    %cst_52 = arith.constant dense<0.000000e+00> : vector<8xf32>
    %85 = vector.multi_reduction <add>, %80, %cst_52 [1] : vector<8x32xf32> to vector<8xf32>
    %86 = vector.shape_cast %85 : vector<8xf32> to vector<8x1xf32>
    %cst_53 = arith.constant 3.200000e+01 : f32
    %87 = vector.broadcast %cst_53 : f32 to vector<8x1xf32>
    %88 = arith.divf %86, %87 : vector<8x1xf32>
    %89 = vector.broadcast %88 : vector<8x1xf32> to vector<8x32xf32>
    %90 = arith.subf %80, %89 : vector<8x32xf32>
    %91 = arith.mulf %90, %90 : vector<8x32xf32>
    %cst_54 = arith.constant dense<0.000000e+00> : vector<8xf32>
    %92 = vector.multi_reduction <add>, %91, %cst_54 [1] : vector<8x32xf32> to vector<8xf32>
    %93 = vector.shape_cast %92 : vector<8xf32> to vector<8x1xf32>
    %cst_55 = arith.constant 3.200000e+01 : f32
    %94 = vector.broadcast %cst_55 : f32 to vector<8x1xf32>
    %95 = arith.divf %93, %94 : vector<8x1xf32>
    %96 = vector.broadcast %88 : vector<8x1xf32> to vector<8x32xf32>
    %97 = arith.subf %80, %96 : vector<8x32xf32>
    %cst_56 = arith.constant 9.99999997E-7 : f32
    %98 = vector.broadcast %cst_56 : f32 to vector<8x1xf32>
    %99 = arith.addf %95, %98 : vector<8x1xf32>
    %100 = math.rsqrt %99 : vector<8x1xf32>
    %101 = vector.broadcast %100 : vector<8x1xf32> to vector<8x32xf32>
    %102 = arith.mulf %97, %101 : vector<8x32xf32>
    %103 = vector.broadcast %82 : vector<1x32xf32> to vector<8x32xf32>
    %104 = arith.mulf %102, %103 : vector<8x32xf32>
    %105 = vector.broadcast %84 : vector<1x32xf32> to vector<8x32xf32>
    %106 = arith.addf %104, %105 : vector<8x32xf32>
    %107 = arith.truncf %106 : vector<8x32xf32> to vector<8x32xbf16>
    %c0_57 = arith.constant 0 : index
    %c0_58 = arith.constant 0 : index
    %c0_59 = arith.constant 0 : index
    %108 = vector.load %arg16[%c0_57, %c0_58, %c0_59] : memref<2x32x128xbf16, #tpu.memory_space<vmem>>, vector<1x32x128xbf16>
    %109 = vector.shape_cast %108 : vector<1x32x128xbf16> to vector<32x128xbf16>
    %cst_60 = arith.constant dense<0.000000e+00> : vector<8x128xf32>
    %110 = tpu.matmul %107, %109, %cst_60 {dimension_numbers = #tpu.dot_dimension_numbers<[1], [0], [0], [1], [0, 0, 1, 1], [], []>} : vector<8x32xbf16>, vector<32x128xbf16>, vector<8x128xf32> -> vector<8x128xf32>
    %c0_61 = arith.constant 0 : index
    %c0_62 = arith.constant 0 : index
    %c0_63 = arith.constant 0 : index
    %111 = vector.load %arg17[%c0_61, %c0_62, %c0_63] : memref<2x1x128xf32, #tpu.memory_space<vmem>>, vector<1x1x128xf32>
    %112 = vector.shape_cast %111 : vector<1x1x128xf32> to vector<1x128xf32>
    %113 = vector.broadcast %112 : vector<1x128xf32> to vector<8x128xf32>
    %114 = arith.addf %110, %113 : vector<8x128xf32>
    %115 = arith.mulf %114, %114 : vector<8x128xf32>
    %116 = arith.mulf %114, %115 : vector<8x128xf32>
    %cst_64 = arith.constant 4.471500e-02 : f32
    %117 = vector.broadcast %cst_64 : f32 to vector<8x128xf32>
    %118 = arith.mulf %117, %116 : vector<8x128xf32>
    %119 = arith.addf %114, %118 : vector<8x128xf32>
    %cst_65 = arith.constant 0.797884583 : f32
    %120 = vector.broadcast %cst_65 : f32 to vector<8x128xf32>
    %121 = arith.mulf %120, %119 : vector<8x128xf32>
    %122 = math.tanh %121 : vector<8x128xf32>
    %cst_66 = arith.constant 1.000000e+00 : f32
    %123 = vector.broadcast %cst_66 : f32 to vector<8x128xf32>
    %124 = arith.addf %123, %122 : vector<8x128xf32>
    %cst_67 = arith.constant 5.000000e-01 : f32
    %125 = vector.broadcast %cst_67 : f32 to vector<8x128xf32>
    %126 = arith.mulf %125, %124 : vector<8x128xf32>
    %127 = arith.mulf %114, %126 : vector<8x128xf32>
    %128 = arith.truncf %127 : vector<8x128xf32> to vector<8x128xbf16>
    %c0_68 = arith.constant 0 : index
    %c0_69 = arith.constant 0 : index
    %c0_70 = arith.constant 0 : index
    %129 = vector.load %arg18[%c0_68, %c0_69, %c0_70] : memref<2x128x32xbf16, #tpu.memory_space<vmem>>, vector<1x128x32xbf16>
    %130 = vector.shape_cast %129 : vector<1x128x32xbf16> to vector<128x32xbf16>
    %cst_71 = arith.constant dense<0.000000e+00> : vector<8x32xf32>
    %131 = tpu.matmul %128, %130, %cst_71 {dimension_numbers = #tpu.dot_dimension_numbers<[1], [0], [0], [1], [0, 0, 1, 1], [], []>} : vector<8x128xbf16>, vector<128x32xbf16>, vector<8x32xf32> -> vector<8x32xf32>
    %c0_72 = arith.constant 0 : index
    %c0_73 = arith.constant 0 : index
    %c0_74 = arith.constant 0 : index
    %132 = vector.load %arg19[%c0_72, %c0_73, %c0_74] : memref<2x1x32xf32, #tpu.memory_space<vmem>>, vector<1x1x32xf32>
    %133 = vector.shape_cast %132 : vector<1x1x32xf32> to vector<1x32xf32>
    %134 = vector.broadcast %133 : vector<1x32xf32> to vector<8x32xf32>
    %135 = arith.addf %131, %134 : vector<8x32xf32>
    %136 = arith.addf %80, %135 : vector<8x32xf32>
    %c1 = arith.constant 1 : index
    %c0_75 = arith.constant 0 : index
    %c0_76 = arith.constant 0 : index
    %137 = vector.load %arg8[%c1, %c0_75, %c0_76] : memref<2x1x32xf32, #tpu.memory_space<vmem>>, vector<1x1x32xf32>
    %138 = vector.shape_cast %137 : vector<1x1x32xf32> to vector<1x32xf32>
    %c1_77 = arith.constant 1 : index
    %c0_78 = arith.constant 0 : index
    %c0_79 = arith.constant 0 : index
    %139 = vector.load %arg9[%c1_77, %c0_78, %c0_79] : memref<2x1x32xf32, #tpu.memory_space<vmem>>, vector<1x1x32xf32>
    %140 = vector.shape_cast %139 : vector<1x1x32xf32> to vector<1x32xf32>
    %cst_80 = arith.constant dense<0.000000e+00> : vector<8xf32>
    %141 = vector.multi_reduction <add>, %136, %cst_80 [1] : vector<8x32xf32> to vector<8xf32>
    %142 = vector.shape_cast %141 : vector<8xf32> to vector<8x1xf32>
    %cst_81 = arith.constant 3.200000e+01 : f32
    %143 = vector.broadcast %cst_81 : f32 to vector<8x1xf32>
    %144 = arith.divf %142, %143 : vector<8x1xf32>
    %145 = vector.broadcast %144 : vector<8x1xf32> to vector<8x32xf32>
    %146 = arith.subf %136, %145 : vector<8x32xf32>
    %147 = arith.mulf %146, %146 : vector<8x32xf32>
    %cst_82 = arith.constant dense<0.000000e+00> : vector<8xf32>
    %148 = vector.multi_reduction <add>, %147, %cst_82 [1] : vector<8x32xf32> to vector<8xf32>
    %149 = vector.shape_cast %148 : vector<8xf32> to vector<8x1xf32>
    %cst_83 = arith.constant 3.200000e+01 : f32
    %150 = vector.broadcast %cst_83 : f32 to vector<8x1xf32>
    %151 = arith.divf %149, %150 : vector<8x1xf32>
    %152 = vector.broadcast %144 : vector<8x1xf32> to vector<8x32xf32>
    %153 = arith.subf %136, %152 : vector<8x32xf32>
    %cst_84 = arith.constant 9.99999997E-7 : f32
    %154 = vector.broadcast %cst_84 : f32 to vector<8x1xf32>
    %155 = arith.addf %151, %154 : vector<8x1xf32>
    %156 = math.rsqrt %155 : vector<8x1xf32>
    %157 = vector.broadcast %156 : vector<8x1xf32> to vector<8x32xf32>
    %158 = arith.mulf %153, %157 : vector<8x32xf32>
    %159 = vector.broadcast %138 : vector<1x32xf32> to vector<8x32xf32>
    %160 = arith.mulf %158, %159 : vector<8x32xf32>
    %161 = vector.broadcast %140 : vector<1x32xf32> to vector<8x32xf32>
    %162 = arith.addf %160, %161 : vector<8x32xf32>
    %163 = arith.truncf %162 : vector<8x32xf32> to vector<8x32xbf16>
    %c1_85 = arith.constant 1 : index
    %c0_86 = arith.constant 0 : index
    %c0_87 = arith.constant 0 : index
    %164 = vector.load %arg10[%c1_85, %c0_86, %c0_87] : memref<2x32x96xbf16, #tpu.memory_space<vmem>>, vector<1x32x96xbf16>
    %165 = vector.shape_cast %164 : vector<1x32x96xbf16> to vector<32x96xbf16>
    %cst_88 = arith.constant dense<0.000000e+00> : vector<8x96xf32>
    %166 = tpu.matmul %163, %165, %cst_88 {dimension_numbers = #tpu.dot_dimension_numbers<[1], [0], [0], [1], [0, 0, 1, 1], [], []>} : vector<8x32xbf16>, vector<32x96xbf16>, vector<8x96xf32> -> vector<8x96xf32>
    %c1_89 = arith.constant 1 : index
    %c0_90 = arith.constant 0 : index
    %c0_91 = arith.constant 0 : index
    %167 = vector.load %arg11[%c1_89, %c0_90, %c0_91] : memref<2x1x96xf32, #tpu.memory_space<vmem>>, vector<1x1x96xf32>
    %168 = vector.shape_cast %167 : vector<1x1x96xf32> to vector<1x96xf32>
    %169 = vector.broadcast %168 : vector<1x96xf32> to vector<8x96xf32>
    %170 = arith.addf %166, %169 : vector<8x96xf32>
    %171 = vector.extract_strided_slice %170 {offsets = [0, 0], sizes = [8, 32], strides = [1, 1]} : vector<8x96xf32> to vector<8x32xf32>
    %172 = vector.extract_strided_slice %170 {offsets = [0, 32], sizes = [8, 32], strides = [1, 1]} : vector<8x96xf32> to vector<8x32xf32>
    %173 = vector.extract_strided_slice %170 {offsets = [0, 64], sizes = [8, 32], strides = [1, 1]} : vector<8x96xf32> to vector<8x32xf32>
    %174 = tpu.concatenate %172, %172, %172, %172 in 0 : vector<8x32xf32>, vector<8x32xf32>, vector<8x32xf32>, vector<8x32xf32> -> vector<32x32xf32>
    %175 = arith.mulf %174, %13 : vector<32x32xf32>
    %176 = arith.truncf %175 : vector<32x32xf32> to vector<32x32xbf16>
    %177 = tpu.concatenate %173, %173, %173, %173 in 0 : vector<8x32xf32>, vector<8x32xf32>, vector<8x32xf32>, vector<8x32xf32> -> vector<32x32xf32>
    %178 = arith.mulf %177, %13 : vector<32x32xf32>
    %179 = arith.truncf %178 : vector<32x32xf32> to vector<32x32xbf16>
    %180 = arith.truncf %171 : vector<8x32xf32> to vector<8x32xbf16>
    %cst_92 = arith.constant dense<0.000000e+00> : vector<8x32xf32>
    %181 = tpu.matmul %180, %176, %cst_92 {dimension_numbers = #tpu.dot_dimension_numbers<[1], [1], [0], [0], [0, 0, 1, 0], [], []>} : vector<8x32xbf16>, vector<32x32xbf16>, vector<8x32xf32> -> vector<8x32xf32>
    %cst_93 = arith.constant 0.353553385 : f32
    %182 = vector.broadcast %cst_93 : f32 to vector<8x32xf32>
    %183 = arith.mulf %181, %182 : vector<8x32xf32>
    %cst_94 = arith.constant dense<0xFF800000> : vector<8xf32>
    %184 = vector.multi_reduction <maximumf>, %183, %cst_94 [1] : vector<8x32xf32> to vector<8xf32>
    %185 = vector.shape_cast %184 : vector<8xf32> to vector<8x1xf32>
    %186 = vector.broadcast %185 : vector<8x1xf32> to vector<8x32xf32>
    %187 = arith.subf %183, %186 : vector<8x32xf32>
    %188 = math.exp %187 : vector<8x32xf32>
    %cst_95 = arith.constant dense<0.000000e+00> : vector<8x32xf32>
    %189 = tpu.matmul %188, %14, %cst_95 {dimension_numbers = #tpu.dot_dimension_numbers<[1], [0], [0], [1], [0, 0, 1, 1], [], []>} : vector<8x32xf32>, vector<32x32xf32>, vector<8x32xf32> -> vector<8x32xf32>
    %190 = tpu.reciprocal %189 {approx = true} : vector<8x32xf32> -> vector<8x32xf32>
    %191 = arith.mulf %188, %190 : vector<8x32xf32>
    %192 = arith.truncf %191 : vector<8x32xf32> to vector<8x32xbf16>
    %cst_96 = arith.constant dense<0.000000e+00> : vector<8x32xf32>
    %193 = tpu.matmul %192, %179, %cst_96 {dimension_numbers = #tpu.dot_dimension_numbers<[1], [0], [0], [1], [0, 0, 1, 1], [], []>} : vector<8x32xbf16>, vector<32x32xbf16>, vector<8x32xf32> -> vector<8x32xf32>
    %194 = arith.truncf %193 : vector<8x32xf32> to vector<8x32xbf16>
    %c1_97 = arith.constant 1 : index
    %c0_98 = arith.constant 0 : index
    %c0_99 = arith.constant 0 : index
    %195 = vector.load %arg12[%c1_97, %c0_98, %c0_99] : memref<2x32x32xbf16, #tpu.memory_space<vmem>>, vector<1x32x32xbf16>
    %196 = vector.shape_cast %195 : vector<1x32x32xbf16> to vector<32x32xbf16>
    %cst_100 = arith.constant dense<0.000000e+00> : vector<8x32xf32>
    %197 = tpu.matmul %194, %196, %cst_100 {dimension_numbers = #tpu.dot_dimension_numbers<[1], [0], [0], [1], [0, 0, 1, 1], [], []>} : vector<8x32xbf16>, vector<32x32xbf16>, vector<8x32xf32> -> vector<8x32xf32>
    %c1_101 = arith.constant 1 : index
    %c0_102 = arith.constant 0 : index
    %c0_103 = arith.constant 0 : index
    %198 = vector.load %arg13[%c1_101, %c0_102, %c0_103] : memref<2x1x32xf32, #tpu.memory_space<vmem>>, vector<1x1x32xf32>
    %199 = vector.shape_cast %198 : vector<1x1x32xf32> to vector<1x32xf32>
    %200 = vector.broadcast %199 : vector<1x32xf32> to vector<8x32xf32>
    %201 = arith.addf %197, %200 : vector<8x32xf32>
    %202 = arith.addf %136, %201 : vector<8x32xf32>
    %c1_104 = arith.constant 1 : index
    %c0_105 = arith.constant 0 : index
    %c0_106 = arith.constant 0 : index
    %203 = vector.load %arg14[%c1_104, %c0_105, %c0_106] : memref<2x1x32xf32, #tpu.memory_space<vmem>>, vector<1x1x32xf32>
    %204 = vector.shape_cast %203 : vector<1x1x32xf32> to vector<1x32xf32>
    %c1_107 = arith.constant 1 : index
    %c0_108 = arith.constant 0 : index
    %c0_109 = arith.constant 0 : index
    %205 = vector.load %arg15[%c1_107, %c0_108, %c0_109] : memref<2x1x32xf32, #tpu.memory_space<vmem>>, vector<1x1x32xf32>
    %206 = vector.shape_cast %205 : vector<1x1x32xf32> to vector<1x32xf32>
    %cst_110 = arith.constant dense<0.000000e+00> : vector<8xf32>
    %207 = vector.multi_reduction <add>, %202, %cst_110 [1] : vector<8x32xf32> to vector<8xf32>
    %208 = vector.shape_cast %207 : vector<8xf32> to vector<8x1xf32>
    %cst_111 = arith.constant 3.200000e+01 : f32
    %209 = vector.broadcast %cst_111 : f32 to vector<8x1xf32>
    %210 = arith.divf %208, %209 : vector<8x1xf32>
    %211 = vector.broadcast %210 : vector<8x1xf32> to vector<8x32xf32>
    %212 = arith.subf %202, %211 : vector<8x32xf32>
    %213 = arith.mulf %212, %212 : vector<8x32xf32>
    %cst_112 = arith.constant dense<0.000000e+00> : vector<8xf32>
    %214 = vector.multi_reduction <add>, %213, %cst_112 [1] : vector<8x32xf32> to vector<8xf32>
    %215 = vector.shape_cast %214 : vector<8xf32> to vector<8x1xf32>
    %cst_113 = arith.constant 3.200000e+01 : f32
    %216 = vector.broadcast %cst_113 : f32 to vector<8x1xf32>
    %217 = arith.divf %215, %216 : vector<8x1xf32>
    %218 = vector.broadcast %210 : vector<8x1xf32> to vector<8x32xf32>
    %219 = arith.subf %202, %218 : vector<8x32xf32>
    %cst_114 = arith.constant 9.99999997E-7 : f32
    %220 = vector.broadcast %cst_114 : f32 to vector<8x1xf32>
    %221 = arith.addf %217, %220 : vector<8x1xf32>
    %222 = math.rsqrt %221 : vector<8x1xf32>
    %223 = vector.broadcast %222 : vector<8x1xf32> to vector<8x32xf32>
    %224 = arith.mulf %219, %223 : vector<8x32xf32>
    %225 = vector.broadcast %204 : vector<1x32xf32> to vector<8x32xf32>
    %226 = arith.mulf %224, %225 : vector<8x32xf32>
    %227 = vector.broadcast %206 : vector<1x32xf32> to vector<8x32xf32>
    %228 = arith.addf %226, %227 : vector<8x32xf32>
    %229 = arith.truncf %228 : vector<8x32xf32> to vector<8x32xbf16>
    %c1_115 = arith.constant 1 : index
    %c0_116 = arith.constant 0 : index
    %c0_117 = arith.constant 0 : index
    %230 = vector.load %arg16[%c1_115, %c0_116, %c0_117] : memref<2x32x128xbf16, #tpu.memory_space<vmem>>, vector<1x32x128xbf16>
    %231 = vector.shape_cast %230 : vector<1x32x128xbf16> to vector<32x128xbf16>
    %cst_118 = arith.constant dense<0.000000e+00> : vector<8x128xf32>
    %232 = tpu.matmul %229, %231, %cst_118 {dimension_numbers = #tpu.dot_dimension_numbers<[1], [0], [0], [1], [0, 0, 1, 1], [], []>} : vector<8x32xbf16>, vector<32x128xbf16>, vector<8x128xf32> -> vector<8x128xf32>
    %c1_119 = arith.constant 1 : index
    %c0_120 = arith.constant 0 : index
    %c0_121 = arith.constant 0 : index
    %233 = vector.load %arg17[%c1_119, %c0_120, %c0_121] : memref<2x1x128xf32, #tpu.memory_space<vmem>>, vector<1x1x128xf32>
    %234 = vector.shape_cast %233 : vector<1x1x128xf32> to vector<1x128xf32>
    %235 = vector.broadcast %234 : vector<1x128xf32> to vector<8x128xf32>
    %236 = arith.addf %232, %235 : vector<8x128xf32>
    %237 = arith.mulf %236, %236 : vector<8x128xf32>
    %238 = arith.mulf %236, %237 : vector<8x128xf32>
    %cst_122 = arith.constant 4.471500e-02 : f32
    %239 = vector.broadcast %cst_122 : f32 to vector<8x128xf32>
    %240 = arith.mulf %239, %238 : vector<8x128xf32>
    %241 = arith.addf %236, %240 : vector<8x128xf32>
    %cst_123 = arith.constant 0.797884583 : f32
    %242 = vector.broadcast %cst_123 : f32 to vector<8x128xf32>
    %243 = arith.mulf %242, %241 : vector<8x128xf32>
    %244 = math.tanh %243 : vector<8x128xf32>
    %cst_124 = arith.constant 1.000000e+00 : f32
    %245 = vector.broadcast %cst_124 : f32 to vector<8x128xf32>
    %246 = arith.addf %245, %244 : vector<8x128xf32>
    %cst_125 = arith.constant 5.000000e-01 : f32
    %247 = vector.broadcast %cst_125 : f32 to vector<8x128xf32>
    %248 = arith.mulf %247, %246 : vector<8x128xf32>
    %249 = arith.mulf %236, %248 : vector<8x128xf32>
    %250 = arith.truncf %249 : vector<8x128xf32> to vector<8x128xbf16>
    %c1_126 = arith.constant 1 : index
    %c0_127 = arith.constant 0 : index
    %c0_128 = arith.constant 0 : index
    %251 = vector.load %arg18[%c1_126, %c0_127, %c0_128] : memref<2x128x32xbf16, #tpu.memory_space<vmem>>, vector<1x128x32xbf16>
    %252 = vector.shape_cast %251 : vector<1x128x32xbf16> to vector<128x32xbf16>
    %cst_129 = arith.constant dense<0.000000e+00> : vector<8x32xf32>
    %253 = tpu.matmul %250, %252, %cst_129 {dimension_numbers = #tpu.dot_dimension_numbers<[1], [0], [0], [1], [0, 0, 1, 1], [], []>} : vector<8x128xbf16>, vector<128x32xbf16>, vector<8x32xf32> -> vector<8x32xf32>
    %c1_130 = arith.constant 1 : index
    %c0_131 = arith.constant 0 : index
    %c0_132 = arith.constant 0 : index
    %254 = vector.load %arg19[%c1_130, %c0_131, %c0_132] : memref<2x1x32xf32, #tpu.memory_space<vmem>>, vector<1x1x32xf32>
    %255 = vector.shape_cast %254 : vector<1x1x32xf32> to vector<1x32xf32>
    %256 = vector.broadcast %255 : vector<1x32xf32> to vector<8x32xf32>
    %257 = arith.addf %253, %256 : vector<8x32xf32>
    %258 = arith.addf %202, %257 : vector<8x32xf32>
    %c0_133 = arith.constant 0 : index
    %c0_134 = arith.constant 0 : index
    %259 = vector.load %arg20[%c0_133, %c0_134] : memref<1x32xf32, #tpu.memory_space<vmem>>, vector<1x32xf32>
    %c0_135 = arith.constant 0 : index
    %c0_136 = arith.constant 0 : index
    %260 = vector.load %arg21[%c0_135, %c0_136] : memref<1x32xf32, #tpu.memory_space<vmem>>, vector<1x32xf32>
    %cst_137 = arith.constant dense<0.000000e+00> : vector<8xf32>
    %261 = vector.multi_reduction <add>, %258, %cst_137 [1] : vector<8x32xf32> to vector<8xf32>
    %262 = vector.shape_cast %261 : vector<8xf32> to vector<8x1xf32>
    %cst_138 = arith.constant 3.200000e+01 : f32
    %263 = vector.broadcast %cst_138 : f32 to vector<8x1xf32>
    %264 = arith.divf %262, %263 : vector<8x1xf32>
    %265 = vector.broadcast %264 : vector<8x1xf32> to vector<8x32xf32>
    %266 = arith.subf %258, %265 : vector<8x32xf32>
    %267 = arith.mulf %266, %266 : vector<8x32xf32>
    %cst_139 = arith.constant dense<0.000000e+00> : vector<8xf32>
    %268 = vector.multi_reduction <add>, %267, %cst_139 [1] : vector<8x32xf32> to vector<8xf32>
    %269 = vector.shape_cast %268 : vector<8xf32> to vector<8x1xf32>
    %cst_140 = arith.constant 3.200000e+01 : f32
    %270 = vector.broadcast %cst_140 : f32 to vector<8x1xf32>
    %271 = arith.divf %269, %270 : vector<8x1xf32>
    %272 = vector.broadcast %264 : vector<8x1xf32> to vector<8x32xf32>
    %273 = arith.subf %258, %272 : vector<8x32xf32>
    %cst_141 = arith.constant 9.99999997E-7 : f32
    %274 = vector.broadcast %cst_141 : f32 to vector<8x1xf32>
    %275 = arith.addf %271, %274 : vector<8x1xf32>
    %276 = math.rsqrt %275 : vector<8x1xf32>
    %277 = vector.broadcast %276 : vector<8x1xf32> to vector<8x32xf32>
    %278 = arith.mulf %273, %277 : vector<8x32xf32>
    %279 = vector.broadcast %259 : vector<1x32xf32> to vector<8x32xf32>
    %280 = arith.mulf %278, %279 : vector<8x32xf32>
    %281 = vector.broadcast %260 : vector<1x32xf32> to vector<8x32xf32>
    %282 = arith.addf %280, %281 : vector<8x32xf32>
    %cst_142 = arith.constant dense<0.000000e+00> : vector<32xf32>
    %283 = vector.multi_reduction <add>, %282, %cst_142 [0] : vector<8x32xf32> to vector<32xf32>
    %284 = vector.shape_cast %283 : vector<32xf32> to vector<1x32xf32>
    %cst_143 = arith.constant 8.000000e+00 : f32
    %285 = vector.broadcast %cst_143 : f32 to vector<1x32xf32>
    %286 = arith.divf %284, %285 : vector<1x32xf32>
    %c0_144 = arith.constant 0 : index
    %c0_145 = arith.constant 0 : index
    %c0_146 = arith.constant 0 : index
    %287 = vector.load %arg22[%c0_144, %c0_145, %c0_146] : memref<1x1x32xf32, #tpu.memory_space<vmem>>, vector<1x1x32xf32>
    %288 = vector.shape_cast %287 : vector<1x1x32xf32> to vector<1x32xf32>
    %289 = vector.shape_cast %286 : vector<1x32xf32> to vector<1x1x32xf32>
    tpu.vector_store %arg22[%c0_144, %c0_145, %c0_146], %289 {strides = array<i32>} : memref<1x1x32xf32, #tpu.memory_space<vmem>>, vector<1x1x32xf32>,
    return
  }
  func.func @transform_0(%arg0: i32) -> (i32, i32, i32) {
    %c0_i32 = arith.constant 0 : i32
    %c0_i32_0 = arith.constant 0 : i32
    %c0_i32_1 = arith.constant 0 : i32
    return %arg0, %c0_i32, %c0_i32_0 : i32, i32, i32
  }
  func.func @transform_1(%arg0: i32) -> (i32, i32, i32) {
    %c0_i32 = arith.constant 0 : i32
    %c0_i32_0 = arith.constant 0 : i32
    %c0_i32_1 = arith.constant 0 : i32
    return %arg0, %c0_i32, %c0_i32_0 : i32, i32, i32
  }
  func.func @transform_2(%arg0: i32) -> (i32, i32) {
    %c0_i32 = arith.constant 0 : i32
    %c0_i32_0 = arith.constant 0 : i32
    %c0_i32_1 = arith.constant 0 : i32
    return %c0_i32, %c0_i32_0 : i32, i32
  }
  func.func @transform_3(%arg0: i32) -> (i32, i32) {
    %c0_i32 = arith.constant 0 : i32
    %c0_i32_0 = arith.constant 0 : i32
    %c0_i32_1 = arith.constant 0 : i32
    return %c0_i32, %c0_i32_0 : i32, i32
  }
  func.func @transform_4(%arg0: i32) -> (i32, i32) {
    %c0_i32 = arith.constant 0 : i32
    %c0_i32_0 = arith.constant 0 : i32
    %c0_i32_1 = arith.constant 0 : i32
    return %c0_i32, %c0_i32_0 : i32, i32
  }
  func.func @transform_5(%arg0: i32) -> (i32, i32) {
    %c0_i32 = arith.constant 0 : i32
    %c0_i32_0 = arith.constant 0 : i32
    %c0_i32_1 = arith.constant 0 : i32
    return %c0_i32, %c0_i32_0 : i32, i32
  }
  func.func @transform_6(%arg0: i32) -> (i32, i32) {
    %c0_i32 = arith.constant 0 : i32
    %c0_i32_0 = arith.constant 0 : i32
    %c0_i32_1 = arith.constant 0 : i32
    return %c0_i32, %c0_i32_0 : i32, i32
  }
  func.func @transform_7(%arg0: i32) -> (i32, i32, i32) {
    %c0_i32 = arith.constant 0 : i32
    %c0_i32_0 = arith.constant 0 : i32
    %c0_i32_1 = arith.constant 0 : i32
    %c0_i32_2 = arith.constant 0 : i32
    return %c0_i32, %c0_i32_0, %c0_i32_1 : i32, i32, i32
  }
  func.func @transform_8(%arg0: i32) -> (i32, i32, i32) {
    %c0_i32 = arith.constant 0 : i32
    %c0_i32_0 = arith.constant 0 : i32
    %c0_i32_1 = arith.constant 0 : i32
    %c0_i32_2 = arith.constant 0 : i32
    return %c0_i32, %c0_i32_0, %c0_i32_1 : i32, i32, i32
  }
  func.func @transform_9(%arg0: i32) -> (i32, i32, i32) {
    %c0_i32 = arith.constant 0 : i32
    %c0_i32_0 = arith.constant 0 : i32
    %c0_i32_1 = arith.constant 0 : i32
    %c0_i32_2 = arith.constant 0 : i32
    return %c0_i32, %c0_i32_0, %c0_i32_1 : i32, i32, i32
  }
  func.func @transform_10(%arg0: i32) -> (i32, i32, i32) {
    %c0_i32 = arith.constant 0 : i32
    %c0_i32_0 = arith.constant 0 : i32
    %c0_i32_1 = arith.constant 0 : i32
    %c0_i32_2 = arith.constant 0 : i32
    return %c0_i32, %c0_i32_0, %c0_i32_1 : i32, i32, i32
  }
  func.func @transform_11(%arg0: i32) -> (i32, i32, i32) {
    %c0_i32 = arith.constant 0 : i32
    %c0_i32_0 = arith.constant 0 : i32
    %c0_i32_1 = arith.constant 0 : i32
    %c0_i32_2 = arith.constant 0 : i32
    return %c0_i32, %c0_i32_0, %c0_i32_1 : i32, i32, i32
  }
  func.func @transform_12(%arg0: i32) -> (i32, i32, i32) {
    %c0_i32 = arith.constant 0 : i32
    %c0_i32_0 = arith.constant 0 : i32
    %c0_i32_1 = arith.constant 0 : i32
    %c0_i32_2 = arith.constant 0 : i32
    return %c0_i32, %c0_i32_0, %c0_i32_1 : i32, i32, i32
  }
  func.func @transform_13(%arg0: i32) -> (i32, i32, i32) {
    %c0_i32 = arith.constant 0 : i32
    %c0_i32_0 = arith.constant 0 : i32
    %c0_i32_1 = arith.constant 0 : i32
    %c0_i32_2 = arith.constant 0 : i32
    return %c0_i32, %c0_i32_0, %c0_i32_1 : i32, i32, i32
  }
  func.func @transform_14(%arg0: i32) -> (i32, i32, i32) {
    %c0_i32 = arith.constant 0 : i32
    %c0_i32_0 = arith.constant 0 : i32
    %c0_i32_1 = arith.constant 0 : i32
    %c0_i32_2 = arith.constant 0 : i32
    return %c0_i32, %c0_i32_0, %c0_i32_1 : i32, i32, i32
  }
  func.func @transform_15(%arg0: i32) -> (i32, i32, i32) {
    %c0_i32 = arith.constant 0 : i32
    %c0_i32_0 = arith.constant 0 : i32
    %c0_i32_1 = arith.constant 0 : i32
    %c0_i32_2 = arith.constant 0 : i32
    return %c0_i32, %c0_i32_0, %c0_i32_1 : i32, i32, i32
  }
  func.func @transform_16(%arg0: i32) -> (i32, i32, i32) {
    %c0_i32 = arith.constant 0 : i32
    %c0_i32_0 = arith.constant 0 : i32
    %c0_i32_1 = arith.constant 0 : i32
    %c0_i32_2 = arith.constant 0 : i32
    return %c0_i32, %c0_i32_0, %c0_i32_1 : i32, i32, i32
  }
  func.func @transform_17(%arg0: i32) -> (i32, i32, i32) {
    %c0_i32 = arith.constant 0 : i32
    %c0_i32_0 = arith.constant 0 : i32
    %c0_i32_1 = arith.constant 0 : i32
    %c0_i32_2 = arith.constant 0 : i32
    return %c0_i32, %c0_i32_0, %c0_i32_1 : i32, i32, i32
  }
  func.func @transform_18(%arg0: i32) -> (i32, i32, i32) {
    %c0_i32 = arith.constant 0 : i32
    %c0_i32_0 = arith.constant 0 : i32
    %c0_i32_1 = arith.constant 0 : i32
    %c0_i32_2 = arith.constant 0 : i32
    return %c0_i32, %c0_i32_0, %c0_i32_1 : i32, i32, i32
  }
  func.func @transform_19(%arg0: i32) -> (i32, i32) {
    %c0_i32 = arith.constant 0 : i32
    %c0_i32_0 = arith.constant 0 : i32
    %c0_i32_1 = arith.constant 0 : i32
    return %c0_i32, %c0_i32_0 : i32, i32
  }
  func.func @transform_20(%arg0: i32) -> (i32, i32) {
    %c0_i32 = arith.constant 0 : i32
    %c0_i32_0 = arith.constant 0 : i32
    %c0_i32_1 = arith.constant 0 : i32
    return %c0_i32, %c0_i32_0 : i32, i32
  }
  func.func @transform_21(%arg0: i32) -> (i32, i32, i32) {
    %c0_i32 = arith.constant 0 : i32
    %c0_i32_0 = arith.constant 0 : i32
    %c0_i32_1 = arith.constant 0 : i32
    return %arg0, %c0_i32, %c0_i32_0 : i32, i32, i32
  }
}

</mosaic_0001>

<bundles_post_ra>
// kernel: forward.1
= control target key start
LH: loop header
LB: loop body
LE: loop exit
PB: predicated region body
PF: predicated region fallthrough
CT: control target
= control target key end

     0   :  { %s3351_s0 = inlined_call_operand.vmem [shape: f32[2,16,192], index: 0, kind: input, shape index: {}]   ;;  %s3352_s1 = inlined_call_operand.vmem [shape: f32[2,8,16], index: 1, kind: input, shape index: {}]   ;;  %s3353_s2 = inlined_call_operand.vmem [shape: f32[16,32], index: 2, kind: input, shape index: {}]   ;;  %s3354_s3 = inlined_call_operand.vmem [shape: f32[32,32], index: 3, kind: input, shape index: {}]   ;;  %s3355_s4 = inlined_call_operand.vmem [shape: f32[32,32], index: 4, kind: input, shape index: {}]   ;;  %s3356_s5 = inlined_call_operand.vmem [shape: bf16[192,32], index: 5, kind: input, shape index: {}]   ;;  %s3357_s6 = inlined_call_operand.vmem [shape: f32[1,32], index: 6, kind: input, shape index: {}]   ;;  %s3358_s7 = inlined_call_operand.vmem [shape: f32[2,1,32], index: 7, kind: input, shape index: {}]   ;;  %s3359_s8 = inlined_call_operand.vmem [shape: f32[2,1,32], index: 8, kind: input, shape index: {}]   ;;  %s3360_s9 = inlined_call_operand.vmem [shape: bf16[2,32,96], index: 9, kind: input, shape index: {}]   ;;  %s3361_s10 = inlined_call_operand.vmem [shape: f32[2,1,96], index: 10, kind: input, shape index: {}]   ;;  %s3362_s11 = inlined_call_operand.vmem [shape: bf16[2,32,32], index: 11, kind: input, shape index: {}]   ;;  %s3363_s12 = inlined_call_operand.vmem [shape: f32[2,1,32], index: 12, kind: input, shape index: {}]   ;;  %s3364_s13 = inlined_call_operand.vmem [shape: f32[2,1,32], index: 13, kind: input, shape index: {}]   ;;  %s3365_s14 = inlined_call_operand.vmem [shape: f32[2,1,32], index: 14, kind: input, shape index: {}]   ;;  %s3366_s15 = inlined_call_operand.vmem [shape: bf16[2,32,128], index: 15, kind: input, shape index: {}]   ;;  %s3367_s16 = inlined_call_operand.vmem [shape: f32[2,1,128], index: 16, kind: input, shape index: {}]   ;;  %s3368_s17 = inlined_call_operand.vmem [shape: bf16[2,128,32], index: 17, kind: input, shape index: {}]   ;;  %s3369_s18 = inlined_call_operand.vmem [shape: f32[2,1,32], index: 18, kind: input, shape index: {}]   ;;  %s3370_s19 = inlined_call_operand.vmem [shape: f32[1,32], index: 19, kind: input, shape index: {}]   ;;  %s3371_s20 = inlined_call_operand.vmem [shape: f32[1,32], index: 20, kind: input, shape index: {}]   ;;  %s3372_s21 = inlined_call_operand.hbm [shape: f32[2,1,32], index: 21, kind: output, shape index: {}]  }
   0x1   :  { %3386 = sst [smem:[#allocation11_spill]] %s3351_s0 }
   0x2   :  { %3387 = sst [smem:[#allocation12_spill]] %s3352_s1 }
   0x3   :  { %3388 = sst [smem:[#allocation13_spill]] %s3353_s2 }
   0x4   :  { %3389 = sst [smem:[#allocation14_spill]] %s3354_s3 }
   0x5   :  { %3390 = sst [smem:[#allocation15_spill]] %s3355_s4 }
   0x6   :  { %3391 = sst [smem:[#allocation16_spill]] %s3356_s5 }
   0x7   :  { %3392 = sst [smem:[#allocation17_spill]] %s3357_s6 }
   0x8   :  { %3393 = sst [smem:[#allocation18_spill]] %s3358_s7 }
   0x9   :  { %3394 = sst [smem:[#allocation19_spill]] %s3372_s21 }
   0xa   :  { %26 = vsyncpa [#allocation3], 0 }
   0xb   :  { %28 = vsyncpa [#allocation3 + $0x1], 0  ;;  %s2859_s2 = smov 0   ;;  %s2861_s25 = smov 0  }
   0xc   :  { %s2863_s26 = smov 0   ;;  %s2865_s27 = smov 0  }
   0xd LB: > { %3395 = sst [smem:[#allocation5_spill]] %s2728_s2  ;;  %s2880_s3 = sadd.s32 4294967295, %s2740_s27   ;;  %s2740_s27 = sphi %s2865_s27, %s3416_s27   ;;  %s2736_s26 = sphi %s2863_s26, %s3418_s26   ;;  %s2732_s25 = sphi %s2861_s25, %s3420_s25   ;;  %s2728_s2 = sphi %s2859_s2, %s3419_s2  }
   0xe   : > { %3396 = sst [smem:[#allocation6_spill]] %s2736_s26  ;;  %s2243_s28 = sadd.s32 4294967294, %s2740_s27  }
   0xf   : > { %3397 = sst [smem:[#allocation7_spill]] %s2740_s27  ;;  %s2884_s29 = sadd.s32 1, %s2740_s27  }
  0x10   : > { %3398 = sst [smem:[#allocation8_spill]] %s2884_s29  ;;  %s492_s0 = sadd.s32 1, %s2736_s26 }
  0x11   : > { %s489_s4 = ssub.s32 %s2740_s27, %s2884_s29  ;;  %p502_p0 = scmp.ne.s32.totalorder %s2736_s26, %s2732_s25 }
  0x12   : > { %p490_p1 = scmp.eq.s32.totalorder %s489_s4, 0  ;;  %p503_p2 = scmp.eq.s32.totalorder %s2880_s3, 1 }
  0x13   : > { %p508_p3 = scmp.ne.s32.totalorder %s2732_s25, %s2728_s2  ;;  %p509_p4 = scmp.eq.s32.totalorder %s2243_s28, 1 }
  0x14   : > { %s2895_s30 = scalar_select %p490_p1, %s2736_s26, %s492_s0  }
  0x15   : > { %p2897_p5 = por %p503_p2, %p502_p0  ;;  %p2901_p6 = por %p509_p4, %p508_p3 }
  0x16   : > { %3399 = sst [smem:[#allocation9_spill]] %s2895_s30  ;;  %p2246_p7 = scmp.ge.s32.totalorder %s2740_s27, 1 }
  0x17   : > { %s3401_s22 = scalar_select %p2901_p6, 1, 0 }
  0x18   : > { %p599_p8 = scmp.lt.s32.totalorder %s2740_s27, 3 }
  0x19   : > { %3402 = sst [smem:[#allocation10_spill]] %s3401_s22 }
  0x1a   : > { %p600_p9 = pnand %p2246_p7, %p599_p8 }
  0x1b   : > { %s3403_s24 = sld [smem:[#allocation16_spill]] (!%p600_p9)  ;;  %p662_p10 = scmp.lt.s32.totalorder (!%p600_p9), %s2880_s3, 1 }
  0x1c   : > { %603 = sbr.rel (%p600_p9) target bundleno = 5473 (0x1561), region = 104  ;;  %s3404_s22 = sld [smem:[#allocation11_spill]] (!%p600_p9) }
  0x1d   : > { %s3405_s6 = sld [smem:[#allocation17_spill]] (!%p600_p9)  ;;  %s2745_s28 = smov (!%p600_p9), 32  }
  0x1e   : > { %s3407_s27 = sld [smem:[#allocation12_spill]] (!%p600_p9)  ;;  %s2747_s0 = smov (!%p600_p9), 96  }
  0x1f   : > { %s3410_s7 = sld [smem:[#allocation18_spill]] (!%p600_p9)  ;;  %s660_s26 = sand.u32 (!%p600_p9), 1, %s2732_s25  }
  0x20   : > { %s2359_s30 = sshll.u32 (!%p600_p9), %s2880_s3, 4  ;;  %s3412_s1 = sld [smem:[#allocation19_spill]] (!%p600_p9) }
  0x21   : > { %v2618_v0 = vld [vmem:[%s3403_s24 + $0x38] sm:$0xff]   ;;  %v2742_v1 = vmov 0   ;;  %v2619_v2 = vld [vmem:[%s3403_s24 + $0x30] sm:$0xff]   ;;  %s2915_s4 = scalar_select %p662_p10, %s2880_s3, 1  ;;  %v2620_v3 = vld [vmem:[%s3403_s24 + $0x28] sm:$0xff]   ;;  %vm781_vm0 = vcmask 523264  }
  0x22   : > { %785 = vmatprep.subr.bf16.mxu0 %v2742_v1  ;;  %v2621_v4 = vld [vmem:[%s3403_s24 + $0x20] sm:$0xff]   ;;  %v2622_v7 = vld [vmem:[%s3403_s24 + $0x18] sm:$0xff]   ;;  %v2623_v9 = vld [vmem:[%s3403_s24 + $0x10] sm:$0xff]   ;;  %v2743_v19 = vmov 0.0   ;;  %vm2744_vm1 = vmmov 0   ;;  %vm831_vm2 = vcmask 130048  }
  0x23   : > { %786 = vmatpush1.bf16.msra.mxu0 %v2618_v0  ;;  %s2362_s23 = sshll.u32 %s2915_s4, 5  ;;  %v2624_v10 = vld [vmem:[%s3403_s24 + $0x8] sm:$0xff]   ;;  %v2625_v11 = vld [vmem:[%s3403_s24] sm:$0xff]   ;;  %v2626_v12 = vld [vmem:[%s3403_s24 + $0x58] sm:$0xff]   ;;  %2424 = vmatprep.subr.mxu1 %v2743_v19  ;;  %vm915_vm3 = vcmask 261120   ;;  %vm2161_vm4 = vcmask 253952  }
  0x24   : > { %787 = vmatprep.subr.bf16.mxu0 %v2742_v1  ;;  %s2924_s2 = scalar_lea.vmem %s3404_s22, %s2362_s23  ;;  %v2627_v13 = vld [vmem:[%s3403_s24 + $0x50] sm:$0xff]   ;;  %v2628_v14 = vld [vmem:[%s3403_s24 + $0x48] sm:$0xff]   ;;  %v2629_v15 = vld [vmem:[%s3403_s24 + $0x40] sm:$0xff]   ;;  %2428 = vmatprep.mubr.msk.f32.mxu1 %vm2744_vm1, %v2743_v19  ;;  %s3406_s23 = sld [smem:[#allocation13_spill]] }
  0x25   : > { %v673_v5 = vld [vmem:[%s2924_s2 + $0x8] sm:$0xff]  ;;  %v675_v6 = vld [vmem:[%s2924_s2 + $0x18] sm:$0xff]  ;;  %v672_v16 = vld [vmem:[%s2924_s2] sm:$0xff] }
  0x26   : > { %v677_v8 = vpack.c.bf16 %v675_v6, %v673_v5  ;;  %v674_v17 = vld [vmem:[%s2924_s2 + $0x10] sm:$0xff]  ;;  %v2250_v21 = vld [vmem:[%s3405_s6] ss:$0 sm:$0xff]  ;;  %s2249_s2 = sshll.u32 %s2915_s4, 3  ;;  %v2630_v40 = vld [vmem:[%s3360_s9 + $0x8] sm:$0xff]   ;;  %s3411_s4 = sld [smem:[#allocation15_spill]] }
  0x27   : > { %788 = vmatpush1.bf16.msra.mxu0 %v2619_v2  ;;  %v676_v18 = vpack.c.bf16 %v674_v17, %v672_v16  ;;  %s670_s21 = scalar_lea.vmem %s3407_s27, %s2249_s2  ;;  %v2631_v41 = vld [vmem:[%s3360_s9] sm:$0xff]   ;;  %s3408_s2 = sld [smem:[#allocation14_spill]] }
  0x28   : > { %789 = vmatprep.subr.bf16.mxu0 %v2742_v1  ;;  %2263 = vmatprep.mubr.msk.bf16.mxu0 %vm781_vm0, %v677_v8  ;;  %v830_v31 = vld [vmem:[%s670_s21] sm:$0xff]  ;;  %s2746_s27 = smov 64   ;;  %s2164_s21 = scalar_lea.sflag [#allocation3], %s660_s26 }
  0x29   : > { %v2265_v50 = vld [vmem:[%s3410_s7] ss:$0 sm:$0xff] }
  0x2a   : > { %v827_v24 = vld [vmem:[%s3406_s23 + $0x8] sm:$0xff]  ;;  %v826_v27 = vld [vmem:[%s3406_s23] sm:$0xff] }
  0x2b   : > { %790 = vmatpush1.bf16.msra.mxu0 %v2620_v3  ;;  %v2266_v52 = vld [vmem:[%s3359_s8] ss:$0 sm:$0xff] }
  0x2c   : > { %791 = vmatprep.subr.bf16.mxu0 %v2742_v1  ;;  %v2267_v62 = vld [vmem:[%s3361_s10] ss:$0 sm:$0xff] }
  0x2d   : > { %s3409_s29 = smov %s3408_s2  ;;  %v905_v42 = vld [vmem:[%s3408_s2] sm:$0xff] }
  0x2e   : > { %v907_v43 = vld [vmem:[%s3409_s29 + $0x10] sm:$0xff]  ;;  %v908_v44 = vld [vmem:[%s3409_s29 + $0x18] sm:$0xff]  ;;  %v906_v45 = vld [vmem:[%s3409_s29 + $0x8] sm:$0xff] }
  0x2f   : > { %792 = vmatpush1.bf16.msra.mxu0 %v2621_v4  ;;  %1019 = vrot.lane.b32.xlu1 %v907_v43, %s2745_s28 }
  0x30   : > { %793 = vmatprep.subr.bf16.mxu0 %v2742_v1 }
  0x33   : > { %794 = vmatpush1.bf16.msra.mxu0 %v2622_v7  ;;  %1021 = vrot.lane.b32.xlu1 %v908_v44, %s2745_s28 }
  0x34   : > { %795 = vmatprep.subr.bf16.mxu0 %v2742_v1 }
  0x37   : > { %796 = vmatpush1.bf16.msra.mxu0 %v2623_v9  ;;  %1017 = vrot.lane.b32.xlu1 %v906_v45, %s2745_s28 }
  0x38   : > { %797 = vmatprep.subr.bf16.mxu0 %v2742_v1 }
  0x3b   : > { %798 = vmatpush1.bf16.msra.mxu0 %v2624_v10 }
  0x3c   : > { %799 = vmatprep.subr.bf16.mxu0 %v2742_v1 }
  0x3f   : > { %800 = vmatpush1.bf16.msra.mxu0 %v2625_v11 }
  0x40   : > { %809 = vmatprep.subr.bf16.mxu0 %v2742_v1 }
  0x43   : > { %810 = vmatpush2.bf16.msra.mxu0 %v2626_v12 }
  0x44   : > { %811 = vmatprep.subr.bf16.mxu0 %v2742_v1 }
  0x47   : > { %812 = vmatpush2.bf16.msra.mxu0 %v2627_v13 }
  0x48   : > { %813 = vmatprep.subr.bf16.mxu0 %v2742_v1 }
  0x4b   : > { %814 = vmatpush2.bf16.msra.mxu0 %v2628_v14 }
  0x4c   : > { %815 = vmatprep.subr.bf16.mxu0 %v2742_v1 }
  0x4f   : > { %816 = vmatpush2.bf16.msra.mxu0 %v2629_v15 }
  0x50   : > { %2474 = vmatprep.subr.bf16.mxu0 %v2743_v19 }
  0x52   : > { %818 = vmatmul.mubr.bf16.vlgmr.msra.gmra.mxu0 %v676_v18 }
  0x53   : > { %2478 = vmatprep.mubr.msk.bf16.mxu0 %vm2744_vm1, %v2743_v19 }
  0xa1   : > { %v3023_v58 = vpop.permute.xlu1 %1019 }
  0xa5   : > { %v3027_v60 = vpop.permute.xlu1 %1021 }
  0xa9   : > { %v3034_v1 = vpop.permute.xlu1 %1017 }
 0x112   : > { %v819_v20 = vpop.f32.mrf.mxu0 }
 0x113   : > { %v820_v25 = vadd.f32 %v2250_v21, %v819_v20 }
 0x114   : > { %v821_v22 = vpop.f32.mrf.mxu0 }
 0x115   : > { %v828_v30 = vadd.f32 %v826_v27, %v820_v25 }
 0x116   : > { %v822_v23 = vpop.f32.mrf.mxu0 }
 0x117   : > { %v823_v26 = vadd.f32 %v2250_v21, %v822_v23 }
 0x118   : > { %v824_v28 = vpop.f32.mrf.mxu0 }
 0x119   : > { %v829_v29 = vadd.f32 %v827_v24, %v823_v26 }
 0x11b   : > { %2425 = vmatpush3.msra.mxu1 %v829_v29 }
 0x11c   : > { %2426 = vmatprep.subr.mxu1 %v2743_v19 }
 0x11d   : > { %2427 = vmatpush3.msra.mxu1 %v828_v30  ;;  %v3061_v30 = vld [vmem:[%s3411_s4 + $0x18] sm:$0xff] }
 0x11e   : > { %2429 = vmatmul.mubr.msk.f32.vlgmr.msra.gmra.mxu1 %vm831_vm2, %v830_v31  ;;  %2431 = vmatprep.subr.bf16.mxu1 %v2743_v19  ;;  %v3066_v31 = vld [vmem:[%s3411_s4 + $0x10] sm:$0xff] }
 0x11f   : > { %2435 = vmatprep.mubr.msk.bf16.mxu1 %vm2744_vm1, %v2743_v19  ;;  %2432 = vmatpush3.bf16.msra.mxu1 %v2630_v40 }
 0x120   : > { %2433 = vmatprep.subr.bf16.mxu1 %v2743_v19 }
 0x123   : > { %2434 = vmatpush3.bf16.msra.mxu1 %v2631_v41 }
 0x124   : > { %2439 = vmatprep.subr.bf16.mxu1 %v2743_v19 }
 0x1de   : > { %v2980_v32 = vpop.f32.mrf.mxu1 }
 0x1df   : > { %v916_v33 = vsel %vm915_vm3, %v2980_v32, 0.0 }
 0x1e0   : > { %917 = vadd.xlane.f32.xlu0 %v916_v33  ;;  %v2430_v34 = vpop.f32.mrf.mxu1  ;;  %v3073_v33 = vld [vmem:[%s3411_s4 + $0x8] sm:$0xff] }
 0x1e1   : > { %v3080_v34 = vld [vmem:[%s3411_s4] sm:$0xff]  ;;  %s2748_s4 = smov [#allocation2]  }
 0x1e2   : > { %s2684_s6 = sshll.u32 %s2748_s4, 4  ;;  %s2685_s6 = int_to_ptr.vmem [resolvable:$false] %s2684_s6 }
 0x1e3   : > { %s2686_s3 = scalar_lea.vmem %s2685_s6, 32 }
 0x269   : > { %v918_v35 = vpop.xlane.xlu0 %917 }
 0x26a   : > { %v920_v36 = vmul.f32 0.03125, %v918_v35 }
 0x26c   : > { %v921_v37 = vsub.f32 %v2980_v32, %v920_v36 }
 0x26e   : > { %v922_v38 = vmul.f32 %v921_v37, %v921_v37 }
 0x270   : > { %v923_v39 = vsel %vm915_vm3, %v922_v38, 0.0 }
 0x271   : > { %924 = vadd.xlane.f32.xlu0 %v923_v39 }
 0x287   : > { %1015 = vrot.lane.b32.xlu0 %v905_v42, %s2745_s28  ;;  %s2174_s28 = scalar_lea.hbm %s3412_s1, %s2359_s30 }
 0x28b   : > { %1037 = vrot.lane.b32.xlu0 %v907_v43, %s2746_s27 }
 0x28f   : > { %1039 = vrot.lane.b32.xlu0 %v908_v44, %s2746_s27 }
 0x293   : > { %1033 = vrot.lane.b32.xlu0 %v905_v42, %s2746_s27 }
 0x297   : > { %1035 = vrot.lane.b32.xlu0 %v906_v45, %s2746_s27  ;;  %v2632_v45 = vld [vmem:[%s3362_s11 + $0x8] sm:$0xff]  }
 0x2fa   : > { %v925_v46 = vpop.xlane.xlu0 %924 }
 0x2fb   : > { %v926_v47 = vmul.f32 0.03125, %v925_v46 }
 0x2fd   : > { %v927_v48 = vadd.f32 1e-06, %v926_v47  ;;  %v2633_v47 = vld [vmem:[%s3362_s11] sm:$0xff]  }
 0x2fe   : > { %v3019_v56 = vpop.permute.xlu0 %1015 }
 0x2ff   : > { %2658 = vrsqrt.f32 %v927_v48 }
 0x302   : > { %v3021_v57 = vpop.permute.xlu0 %1037 }
 0x306   : > { %v3025_v59 = vpop.permute.xlu0 %1039 }
 0x30a   : > { %v3029_v61 = vpop.permute.xlu0 %1033 }
 0x30c   : > { %v2659_v49 = vpop.eup %2658 }
 0x30d   : > { %v929_v51 = vmul.f32 %v2659_v49, %v921_v37 }
 0x30e   : > { %v3036_v3 = vpop.permute.xlu0 %1035 }
 0x30f   : > { %v936_v53 = vmul.f32 %v2265_v50, %v929_v51 }
 0x311   : > { %v943_v54 = vadd.f32 %v2266_v52, %v936_v53  ;;  %v2274_v53 = vld [vmem:[%s3363_s12] ss:$0 sm:$0xff] }
 0x313   : > { %v944_v55 = vpack.c.bf16 %v943_v54, %v943_v54 }
 0x315   : > { %2436 = vmatmul.mubr.msk.bf16.vlgmr.msra.gmra.mxu1 %vm915_vm3, %v944_v55 }
 0x316   : > { %2443 = vmatprep.mubr.msk.bf16.mxu1 %vm2744_vm1, %v2743_v19 }
 0x3d5   : > { %v1005_v63 = vpop.f32.mrf.mxu1 }
 0x3d6   : > { %v1006_v0 = vadd.f32 %v2267_v62, %v1005_v63 }
 0x3d7   : > { %v2437_v2 = vpop.f32.mrf.mxu1 }
 0x3d8   : > { %v1047_v5 = vmul.f32 %v3021_v57, %v1006_v0  ;;  %v1048_v6 = vmul.f32 %v3025_v59, %v1006_v0  ;;  %v1029_v7 = vmul.f32 %v3023_v58, %v1006_v0  ;;  %v1030_v8 = vmul.f32 %v3027_v60, %v1006_v0 }
 0x3d9   : > { %v1008_v4 = vpop.f32.mrf.mxu1  ;;  %v1027_v9 = vmul.f32 %v3019_v56, %v1006_v0  ;;  %v1028_v10 = vmul.f32 %v3034_v1, %v1006_v0  ;;  %v1045_v11 = vmul.f32 %v3029_v61, %v1006_v0  ;;  %v1046_v12 = vmul.f32 %v3036_v3, %v1006_v0 }
 0x3da   : > { %v1050_v14 = vpack.c.bf16 %v1048_v6, %v1047_v5  ;;  %v1032_v15 = vpack.c.bf16 %v1030_v8, %v1029_v7  ;;  %v1051_v23 = vpack.c.bf16 %v1006_v0, %v1006_v0 }
 0x3db   : > { %v2438_v13 = vpop.f32.mrf.mxu1  ;;  %v1031_v16 = vpack.c.bf16 %v1028_v10, %v1027_v9  ;;  %v1049_v17 = vpack.c.bf16 %v1046_v12, %v1045_v11  ;;  %v2634_v10 = vld [vmem:[%s3366_s15 + $0x8] sm:$0xff]  }
 0x3dc   : > { %1194 = vrot.lane.b32.xlu0 %v1050_v14, %s2746_s27  ;;  %1056 = vrot.lane.b32.xlu1 %v1032_v15, %s2747_s0  ;;  %v2278_v15 = vld [vmem:[%s3364_s13] ss:$0 sm:$0xff] }
 0x3dd   : > { %2475 = vmatpush3.bf16.msra.mxu0 %v2634_v10 }
 0x3de   : > { %2476 = vmatprep.subr.bf16.mxu0 %v2743_v19 }
 0x3e0   : > { %1192 = vrot.lane.b32.xlu0 %v1049_v17, %s2746_s27  ;;  %1054 = vrot.lane.b32.xlu1 %v1031_v16, %s2747_s0  ;;  %v2279_v17 = vld [vmem:[%s3365_s14] ss:$0 sm:$0xff] }
 0x44e   : > { %v1057_v18 = vpop.permute.xlu1 %1056  ;;  %v1195_v38 = vpop.permute.xlu0 %1194 }
 0x44f   : > { %v1065_v20 = vsel %vm915_vm3, %v1057_v18, 0 }
 0x450   : > { %2440 = vmatpush3.bf16.xpose.msra.mxu1 %v1065_v20 }
 0x451   : > { %2441 = vmatprep.subr.bf16.mxu1 %v2743_v19 }
 0x452   : > { %v1055_v21 = vpop.permute.xlu1 %1054  ;;  %v1193_v40 = vpop.permute.xlu0 %1192 }
 0x453   : > { %v1062_v22 = vsel %vm915_vm3, %v1055_v21, 0 }
 0x458   : > { %2442 = vmatpush3.bf16.xpose.msra.mxu1 %v1062_v22  ;;  %v2636_v22 = vld [vmem:[%s3368_s17 + $0x38] sm:$0xff]  }
 0x459   : > { %2447 = vmatprep.subr.mxu1 %v2743_v19 }
 0x45f   : > { %2444 = vmatmul.mubr.msk.bf16.vlgmr.msra.gmra.mxu1 %vm915_vm3, %v1051_v23  ;;  %v2637_v23 = vld [vmem:[%s3368_s17 + $0x30] sm:$0xff]  }
 0x460   : > { %2455 = vmatprep.mubr.msk.f32.mxu1 %vm2744_vm1, %v2743_v19  ;;  %2448 = vmatpush3.msra.mxu1 %v3061_v30 }
 0x461   : > { %2449 = vmatprep.subr.mxu1 %v2743_v19 }
 0x462   : > { %2450 = vmatpush3.msra.mxu1 %v3066_v31 }
 0x463   : > { %2451 = vmatprep.subr.mxu1 %v2743_v19 }
 0x464   : > { %2452 = vmatpush3.msra.mxu1 %v3073_v33 }
 0x465   : > { %2453 = vmatprep.subr.mxu1 %v2743_v19 }
 0x466   : > { %2454 = vmatpush3.msra.mxu1 %v3080_v34 }
 0x467   : > { %2458 = vmatprep.subr.bf16.mxu1 %v2743_v19 }
 0x51f   : > { %v1101_v24 = vpop.f32.mrf.mxu1 }
 0x520   : > { %v1107_v25 = vmul.f32 0.35355338, %v1101_v24  ;;  %v2638_v24 = vld [vmem:[%s3368_s17 + $0x28] sm:$0xff]  }
 0x521   : > { %v2445_v26 = vpop.f32.mrf.mxu1 }
 0x522   : > { %v1108_v27 = vsel %vm915_vm3, %v1107_v25, -inf  ;;  %v2640_v26 = vld [vmem:[%s3368_s17 + $0x18] sm:$0xff]  }
 0x523   : > { %1109 = vmax.xlane.f32.xlu1 %v1108_v27  ;;  %v1104_v28 = vpop.f32.mrf.mxu1  ;;  %v2641_v27 = vld [vmem:[%s3368_s17 + $0x10] sm:$0xff]  }
 0x524   : > { %v2642_v28 = vld [vmem:[%s3368_s17 + $0x8] sm:$0xff]  }
 0x525   : > { %v2446_v29 = vpop.f32.mrf.mxu1 }
 0x526   : > { %v2643_v29 = vld [vmem:[%s3368_s17] sm:$0xff]  }
 0x5ac   : > { %v1110_v35 = vpop.xlane.xlu1 %1109 }
 0x5ad   : > { %v1111_v36 = vsub.f32 %v1107_v25, %v1110_v35  ;;  %v2639_v25 = vld [vmem:[%s3368_s17 + $0x20] sm:$0xff]  }
 0x5ae   : > { %v2280_v35 = vld [vmem:[%s3367_s16] ss:$0 sm:$0xff] }
 0x5af   : > { %v1112_v37 = vmul.f32 1.442695, %v1111_v36 }
 0x5b1   : > { %2660 = vpow2.f32 %v1112_v37 }
 0x5be   : > { %v2661_v39 = vpop.eup %2660 }
 0x5bf   : > { %2456 = vmatmul.mubr.msk.f32.vlgmr.msra.gmra.mxu1 %vm915_vm3, %v2661_v39 }
 0x5c0   : > { %2459 = vmatpush3.bf16.msra.mxu1 %v1195_v38  ;;  %2462 = vmatprep.mubr.msk.bf16.mxu1 %vm2744_vm1, %v2743_v19 }
 0x5c1   : > { %2460 = vmatprep.subr.bf16.mxu1 %v2743_v19 }
 0x5c4   : > { %2461 = vmatpush3.bf16.msra.mxu1 %v1193_v40 }
 0x5c5   : > { %2466 = vmatprep.subr.bf16.mxu1 %v2743_v19 }
 0x67f   : > { %v1183_v41 = vpop.f32.mrf.mxu1 }
 0x680   : > { %2662 = vrcp.f32 %v1183_v41 }
 0x681   : > { %v2457_v42 = vpop.f32.mrf.mxu1 }
 0x68d   : > { %v2663_v43 = vpop.eup %2662 }
 0x68e   : > { %v1188_v44 = vmul.f32 %v2663_v43, %v2661_v39 }
 0x690   : > { %v1189_v46 = vpack.c.bf16 %v1188_v44, %v1188_v44 }
 0x692   : > { %2463 = vmatmul.mubr.msk.bf16.vlgmr.msra.gmra.mxu1 %vm915_vm3, %v1189_v46 }
 0x693   : > { %2467 = vmatpush3.bf16.msra.mxu1 %v2632_v45  ;;  %2470 = vmatprep.mubr.msk.bf16.mxu1 %vm2744_vm1, %v2743_v19 }
 0x694   : > { %2468 = vmatprep.subr.bf16.mxu1 %v2743_v19 }
 0x697   : > { %2469 = vmatpush3.bf16.msra.mxu1 %v2633_v47 }
 0x698   : > { %2482 = vmatprep.subr.bf16.mxu1 %v2743_v19 }
 0x752   : > { %v1235_v48 = vpop.f32.mrf.mxu1 }
 0x753   : > { %v1241_v49 = vpack.c.bf16 %v1235_v48, %v1235_v48 }
 0x754   : > { %v2464_v50 = vpop.f32.mrf.mxu1 }
 0x755   : > { %2471 = vmatmul.mubr.msk.bf16.vlgmr.msra.gmra.mxu1 %vm915_vm3, %v1241_v49 }
 0x756   : > { %v1238_v51 = vpop.f32.mrf.mxu1  ;;  %2498 = vmatprep.mubr.msk.bf16.mxu1 %vm2744_vm1, %v2743_v19  ;;  %2483 = vmatpush3.bf16.msra.mxu1 %v2636_v22 }
 0x757   : > { %2484 = vmatprep.subr.bf16.mxu1 %v2743_v19  ;;  %v2284_v51 = vld [vmem:[%s3369_s18] ss:$0 sm:$0xff] }
 0x758   : > { %v2465_v52 = vpop.f32.mrf.mxu1 }
 0x75a   : > { %2485 = vmatpush3.bf16.msra.mxu1 %v2637_v23 }
 0x75b   : > { %2486 = vmatprep.subr.bf16.mxu1 %v2743_v19 }
 0x75e   : > { %2487 = vmatpush3.bf16.msra.mxu1 %v2638_v24 }
 0x75f   : > { %2488 = vmatprep.subr.bf16.mxu1 %v2743_v19 }
 0x762   : > { %2489 = vmatpush3.bf16.msra.mxu1 %v2639_v25 }
 0x763   : > { %2490 = vmatprep.subr.bf16.mxu1 %v2743_v19 }
 0x766   : > { %2491 = vmatpush3.bf16.msra.mxu1 %v2640_v26 }
 0x767   : > { %2492 = vmatprep.subr.bf16.mxu1 %v2743_v19 }
 0x76a   : > { %2493 = vmatpush3.bf16.msra.mxu1 %v2641_v27 }
 0x76b   : > { %2494 = vmatprep.subr.bf16.mxu1 %v2743_v19 }
 0x76e   : > { %2495 = vmatpush3.bf16.msra.mxu1 %v2642_v28 }
 0x76f   : > { %2496 = vmatprep.subr.bf16.mxu1 %v2743_v19 }
 0x772   : > { %2497 = vmatpush3.bf16.msra.mxu1 %v2643_v29 }
 0x773   : > { %2510 = vmatprep.subr.bf16.mxu1 %v2743_v19 }
 0x815   : > { %v1302_v54 = vpop.f32.mrf.mxu1 }
 0x816   : > { %v1303_v55 = vadd.f32 %v2274_v53, %v1302_v54 }
 0x817   : > { %v2472_v62 = vpop.f32.mrf.mxu1 }
 0x818   : > { %v3109_v63 = vadd.f32 %v1303_v55, %v2980_v32  ;;  %v2635_v32 = vld [vmem:[%s3366_s15] sm:$0xff]  }
 0x819   : > { %v1305_v0 = vpop.f32.mrf.mxu1  ;;  %2477 = vmatpush3.bf16.msra.mxu0 %v2635_v32 }
 0x81a   : > { %v1311_v2 = vsel %vm915_vm3, %v3109_v63, 0.0  ;;  %2502 = vmatprep.subr.bf16.mxu0 %v2743_v19 }
 0x81b   : > { %1312 = vadd.xlane.f32.xlu0 %v1311_v2  ;;  %v2473_v4 = vpop.f32.mrf.mxu1 }
 0x8a4   : > { %v1313_v5 = vpop.xlane.xlu0 %1312 }
 0x8a5   : > { %v1314_v6 = vmul.f32 0.03125, %v1313_v5 }
 0x8a7   : > { %v1315_v7 = vsub.f32 %v3109_v63, %v1314_v6 }
 0x8a9   : > { %v1316_v8 = vmul.f32 %v1315_v7, %v1315_v7 }
 0x8ab   : > { %v1317_v9 = vsel %vm915_vm3, %v1316_v8, 0.0 }
 0x8ac   : > { %1318 = vadd.xlane.f32.xlu1 %v1317_v9  ;;  %v2644_v9 = vld [vmem:[%s3360_s9 + $0x18] sm:$0xff]  }
 0x935   : > { %v1319_v11 = vpop.xlane.xlu1 %1318 }
 0x936   : > { %v1320_v12 = vmul.f32 0.03125, %v1319_v11 }
 0x938   : > { %v1321_v13 = vadd.f32 1e-06, %v1320_v12 }
 0x93a   : > { %2664 = vrsqrt.f32 %v1321_v13  ;;  %v2295_v13 = vld [vmem:[%s3410_s7 + $0x1] ss:$0 sm:$0xff] }
 0x947   : > { %v2665_v14 = vpop.eup %2664 }
 0x948   : > { %v1323_v16 = vmul.f32 %v2665_v14, %v1315_v7 }
 0x94a   : > { %v1330_v18 = vmul.f32 %v2278_v15, %v1323_v16  ;;  %v2296_v15 = vld [vmem:[%s3359_s8 + $0x1] ss:$0 sm:$0xff] }
 0x94c   : > { %v1337_v20 = vadd.f32 %v2279_v17, %v1330_v18 }
 0x94e   : > { %v1338_v21 = vpack.c.bf16 %v1337_v20, %v1337_v20 }
 0x950   : > { %2479 = vmatmul.mubr.msk.bf16.vlgmr.msra.gmra.mxu0 %vm915_vm3, %v1338_v21 }
 0x951   : > { %2506 = vmatprep.mubr.msk.bf16.mxu0 %vm2744_vm1, %v2743_v19  ;;  %2503 = vmatpush3.bf16.msra.mxu0 %v2644_v9 }
 0x952   : > { %2504 = vmatprep.subr.bf16.mxu0 %v2743_v19 }
 0xa10   : > { %v1399_v36 = vpop.f32.mrf.mxu0 }
 0xa11   : > { %v1400_v37 = vadd.f32 %v2280_v35, %v1399_v36 }
 0xa12   : > { %v2480_v38 = vpop.f32.mrf.mxu0 }
 0xa13   : > { %v1405_v39 = vmul.f32 %v1400_v37, %v1400_v37 }
 0xa14   : > { %v1402_v40 = vpop.f32.mrf.mxu0 }
 0xa15   : > { %v1406_v41 = vmul.f32 %v1405_v39, %v1400_v37 }
 0xa16   : > { %v2481_v42 = vpop.f32.mrf.mxu0 }
 0xa17   : > { %v1407_v43 = vmul.f32 0.044715, %v1406_v41 }
 0xa19   : > { %v1408_v44 = vadd.f32 %v1407_v43, %v1400_v37 }
 0xa1b   : > { %v1409_v45 = vmul.f32 0.7978846, %v1408_v44 }
 0xa1d   : > { %2666 = vtanh.f32 %v1409_v45 }
 0xa2a   : > { %v2667_v46 = vpop.eup %2666 }
 0xa2b   : > { %v1411_v47 = vadd.f32 1.0, %v2667_v46 }
 0xa2d   : > { %v1412_v48 = vmul.f32 0.5, %v1411_v47 }
 0xa2f   : > { %v1413_v49 = vmul.f32 %v1412_v48, %v1400_v37  ;;  %v2646_v48 = vld [vmem:[%s3362_s11 + $0x18] sm:$0xff]  }
 0xa31   : > { %v1414_v50 = vpack.c.bf16 %v1413_v49, %v1413_v49 }
 0xa33   : > { %2499 = vmatmul.mubr.bf16.vlgmr.msra.gmra.mxu1 %v1414_v50 }
 0xa34   : > { %2514 = vmatprep.mubr.msk.bf16.mxu1 %vm2744_vm1, %v2743_v19 }
 0xaf3   : > { %v1520_v52 = vpop.f32.mrf.mxu1 }
 0xaf4   : > { %v1521_v53 = vadd.f32 %v2284_v51, %v1520_v52 }
 0xaf5   : > { %v2500_v54 = vpop.f32.mrf.mxu1 }
 0xaf6   : > { %v3173_v55 = vadd.f32 %v1521_v53, %v3109_v63  ;;  %v2645_v63 = vld [vmem:[%s3360_s9 + $0x10] sm:$0xff]  }
 0xaf7   : > { %v1523_v62 = vpop.f32.mrf.mxu1  ;;  %2505 = vmatpush3.bf16.msra.mxu0 %v2645_v63  ;;  %v2647_v54 = vld [vmem:[%s3362_s11 + $0x10] sm:$0xff]  }
 0xaf8   : > { %v1531_v0 = vsel %vm915_vm3, %v3173_v55, 0.0  ;;  %2518 = vmatprep.subr.mxu0 %v2743_v19 }
 0xaf9   : > { %1532 = vadd.xlane.f32.xlu1 %v1531_v0  ;;  %v2501_v2 = vpop.f32.mrf.mxu1 }
 0xb82   : > { %v1533_v4 = vpop.xlane.xlu1 %1532 }
 0xb83   : > { %v1534_v5 = vmul.f32 0.03125, %v1533_v4 }
 0xb85   : > { %v1535_v6 = vsub.f32 %v3173_v55, %v1534_v5 }
 0xb87   : > { %v1536_v7 = vmul.f32 %v1535_v6, %v1535_v6 }
 0xb89   : > { %v1537_v8 = vsel %vm915_vm3, %v1536_v7, 0.0 }
 0xb8a   : > { %1538 = vadd.xlane.f32.xlu1 %v1537_v8 }
 0xc13   : > { %v1539_v10 = vpop.xlane.xlu1 %1538 }
 0xc14   : > { %v1540_v32 = vmul.f32 0.03125, %v1539_v10 }
 0xc16   : > { %v1541_v11 = vadd.f32 1e-06, %v1540_v32 }
 0xc18   : > { %2668 = vrsqrt.f32 %v1541_v11 }
 0xc25   : > { %v2669_v12 = vpop.eup %2668 }
 0xc26   : > { %v1543_v14 = vmul.f32 %v2669_v12, %v1535_v6  ;;  %v2314_v6 = vld [vmem:[%s3363_s12 + $0x1] ss:$0 sm:$0xff] }
 0xc28   : > { %v1550_v16 = vmul.f32 %v2295_v13, %v1543_v14 }
 0xc2a   : > { %v1557_v17 = vadd.f32 %v2296_v15, %v1550_v16 }
 0xc2c   : > { %v1558_v18 = vpack.c.bf16 %v1557_v17, %v1557_v17  ;;  %v2648_v17 = vld [vmem:[%s3366_s15 + $0x18] sm:$0xff]  }
 0xc2e   : > { %2507 = vmatmul.mubr.msk.bf16.vlgmr.msra.gmra.mxu0 %vm915_vm3, %v1558_v18 }
 0xc2f   : > { %2519 = vmatpush3.msra.mxu0 %v3061_v30  ;;  %2526 = vmatprep.mubr.msk.f32.mxu0 %vm2744_vm1, %v2743_v19  ;;  %v2302_v30 = vld [vmem:[%s3361_s10 + $0x1] ss:$0 sm:$0xff] }
 0xc30   : > { %2520 = vmatprep.subr.mxu0 %v2743_v19 }
 0xc31   : > { %2521 = vmatpush3.msra.mxu0 %v3066_v31 }
 0xc32   : > { %2522 = vmatprep.subr.mxu0 %v2743_v19 }
 0xc33   : > { %2523 = vmatpush3.msra.mxu0 %v3073_v33 }
 0xc34   : > { %2524 = vmatprep.subr.mxu0 %v2743_v19 }
 0xc35   : > { %2525 = vmatpush3.msra.mxu0 %v3080_v34 }
 0xc36   : > { %2537 = vmatprep.subr.bf16.mxu0 %v2743_v19 }
 0xcee   : > { %v1621_v20 = vpop.f32.mrf.mxu0 }
 0xcef   : > { %v1622_v21 = vadd.f32 %v2302_v30, %v1621_v20 }
 0xcf0   : > { %v2508_v22 = vpop.f32.mrf.mxu0 }
 0xcf1   : > { %v1629_v23 = vmul.f32 %v1622_v21, %v3023_v58  ;;  %v1630_v31 = vmul.f32 %v1622_v21, %v3027_v60  ;;  %v1627_v24 = vmul.f32 %v1622_v21, %v3019_v56  ;;  %v1628_v33 = vmul.f32 %v1622_v21, %v3034_v1  ;;  %v2320_v22 = vld [vmem:[%s3364_s13 + $0x1] ss:$0 sm:$0xff] }
 0xcf2   : > { %v1624_v25 = vpop.f32.mrf.mxu0  ;;  %v1635_v27 = vmul.f32 %v1622_v21, %v3021_v57  ;;  %v1636_v28 = vmul.f32 %v1622_v21, %v3025_v59  ;;  %v1633_v58 = vmul.f32 %v1622_v21, %v3029_v61  ;;  %v1634_v60 = vmul.f32 %v1622_v21, %v3036_v3 }
 0xcf3   : > { %v1632_v26 = vpack.c.bf16 %v1630_v31, %v1629_v23  ;;  %v1631_v34 = vpack.c.bf16 %v1628_v33, %v1627_v24  ;;  %v1639_v37 = vpack.c.bf16 %v1622_v21, %v1622_v21  ;;  %v2321_v31 = vld [vmem:[%s3365_s14 + $0x1] ss:$0 sm:$0xff] }
 0xcf4   : > { %v2509_v29 = vpop.f32.mrf.mxu0  ;;  %v1638_v35 = vpack.c.bf16 %v1636_v28, %v1635_v27  ;;  %v1637_v56 = vpack.c.bf16 %v1634_v60, %v1633_v58  ;;  %v2652_v27 = vld [vmem:[%s3368_s17 + $0x68] sm:$0xff]   ;;  %v2653_v28 = vld [vmem:[%s3368_s17 + $0x60] sm:$0xff]  }
 0xcf5   : > { %1644 = vrot.lane.b32.xlu1 %v1632_v26, %s2747_s0  ;;  %1642 = vrot.lane.b32.xlu0 %v1631_v34, %s2747_s0  ;;  %v2650_v26 = vld [vmem:[%s3368_s17 + $0x78] sm:$0xff]   ;;  %v2651_v34 = vld [vmem:[%s3368_s17 + $0x70] sm:$0xff]  }
 0xcf6   : > { %v2654_v29 = vld [vmem:[%s3368_s17 + $0x58] sm:$0xff]   ;;  %v2656_v58 = vld [vmem:[%s3368_s17 + $0x48] sm:$0xff]   ;;  %v2657_v60 = vld [vmem:[%s3368_s17 + $0x40] sm:$0xff]  }
 0xcf9   : > { %1782 = vrot.lane.b32.xlu0 %v1638_v35, %s2746_s27  ;;  %v2655_v35 = vld [vmem:[%s3368_s17 + $0x50] sm:$0xff]  }
 0xcfd   : > { %1780 = vrot.lane.b32.xlu0 %v1637_v56, %s2746_s27  ;;  %v2327_v56 = vld [vmem:[%s3367_s16 + $0x1] ss:$0 sm:$0xff]  ;;  %s661_s27 = scalar_lea.vmem [#allocation2], %s660_s26 }
 0xcfe   : > { %s2176_s0 = sshll.u32 %s661_s27, 4  ;;  %s2177_s0 = int_to_ptr.vmem [resolvable:$true] %s2176_s0 }
 0xcff   : > { %s2680_s24 = scalar_lea.vmem %s2177_s0, 16  ;;  %p2687_p0 = scmp.lt.s32.totalorder %s2177_s0, %s2685_s6 }
 0xd00   : > { %p2681_p11 = scmp.ne.s32.totalorder %s2177_s0, %s2680_s24  ;;  %p2688_p1 = scmp.lt.s32.totalorder %s2686_s3, %s2680_s24 }
 0xd02   : > { %p2682_p12 = pnand %p2681_p11, %p2897_p5  ;;  %p2689_p2 = por %p2688_p1, %p2687_p0 }
 0xd04   : > { %p2683_p13 = pneg %p2682_p12 }
 0xd06   : > { %p2690_p3 = pnand %p2689_p2, %p2683_p13 }
 0xd67   : > { %v1645_v1 = vpop.permute.xlu1 %1644  ;;  %v1643_v59 = vpop.permute.xlu0 %1642 }
 0xd68   : > { %v1653_v57 = vsel %vm915_vm3, %v1645_v1, 0  ;;  %v1650_v36 = vsel %vm915_vm3, %v1643_v59, 0 }
 0xd69   : > { %2511 = vmatpush3.bf16.xpose.msra.mxu1 %v1653_v57 }
 0xd6a   : > { %2512 = vmatprep.subr.bf16.mxu1 %v2743_v19 }
 0xd6b   : > { %v1783_v61 = vpop.permute.xlu0 %1782 }
 0xd6f   : > { %v1781_v3 = vpop.permute.xlu0 %1780 }
 0xd71   : > { %2513 = vmatpush3.bf16.xpose.msra.mxu1 %v1650_v36 }
 0xd72   : > { %2529 = vmatprep.subr.bf16.mxu1 %v2743_v19 }
 0xd78   : > { %2515 = vmatmul.mubr.msk.bf16.vlgmr.msra.gmra.mxu1 %vm915_vm3, %v1639_v37 }
 0xd79   : > { %2530 = vmatpush3.bf16.msra.mxu1 %v1783_v61  ;;  %2533 = vmatprep.mubr.msk.bf16.mxu1 %vm2744_vm1, %v2743_v19 }
 0xd7a   : > { %2531 = vmatprep.subr.bf16.mxu1 %v2743_v19 }
 0xd7d   : > { %2532 = vmatpush3.bf16.msra.mxu1 %v1781_v3 }
 0xd7e   : > { %2545 = vmatprep.subr.bf16.mxu1 %v2743_v19 }
 0xe38   : > { %v1689_v38 = vpop.f32.mrf.mxu1 }
 0xe39   : > { %v1695_v39 = vmul.f32 0.35355338, %v1689_v38 }
 0xe3a   : > { %v2516_v40 = vpop.f32.mrf.mxu1 }
 0xe3b   : > { %v1696_v41 = vsel %vm915_vm3, %v1695_v39, -inf }
 0xe3c   : > { %1697 = vmax.xlane.f32.xlu1 %v1696_v41  ;;  %v1692_v42 = vpop.f32.mrf.mxu1 }
 0xe3e   : > { %v2517_v43 = vpop.f32.mrf.mxu1 }
 0xec5   : > { %v1698_v44 = vpop.xlane.xlu1 %1697 }
 0xec6   : > { %v1699_v45 = vsub.f32 %v1695_v39, %v1698_v44 }
 0xec8   : > { %v1700_v46 = vmul.f32 1.442695, %v1699_v45  ;;  %v2348_v45 = vld [vmem:[%s3369_s18 + $0x1] ss:$0 sm:$0xff] }
 0xeca   : > { %2670 = vpow2.f32 %v1700_v46 }
 0xed7   : > { %v2671_v47 = vpop.eup %2670 }
 0xed8   : > { %2527 = vmatmul.mubr.msk.f32.vlgmr.msra.gmra.mxu0 %vm915_vm3, %v2671_v47 }
 0xed9   : > { %2541 = vmatprep.mubr.msk.bf16.mxu0 %vm2744_vm1, %v2743_v19  ;;  %2538 = vmatpush3.bf16.msra.mxu0 %v2646_v48 }
 0xeda   : > { %2539 = vmatprep.subr.bf16.mxu0 %v2743_v19 }
 0xedd   : > { %2540 = vmatpush3.bf16.msra.mxu0 %v2647_v54 }
 0xede   : > { %2553 = vmatprep.subr.bf16.mxu0 %v2743_v19 }
 0xf98   : > { %v1771_v49 = vpop.f32.mrf.mxu0 }
 0xf99   : > { %2672 = vrcp.f32 %v1771_v49 }
 0xf9a   : > { %v2528_v50 = vpop.f32.mrf.mxu0 }
 0xfa6   : > { %v2673_v51 = vpop.eup %2672 }
 0xfa7   : > { %v1776_v52 = vmul.f32 %v2673_v51, %v2671_v47 }
 0xfa9   : > { %v1777_v53 = vpack.c.bf16 %v1776_v52, %v1776_v52 }
 0xfab   : > { %2534 = vmatmul.mubr.msk.bf16.vlgmr.msra.gmra.mxu1 %vm915_vm3, %v1777_v53 }
 0xfac   : > { %2549 = vmatprep.mubr.msk.bf16.mxu1 %vm2744_vm1, %v2743_v19  ;;  %2546 = vmatpush3.bf16.msra.mxu1 %v2648_v17 }
 0xfad   : > { %2547 = vmatprep.subr.bf16.mxu1 %v2743_v19 }
0x106b   : > { %v1823_v62 = vpop.f32.mrf.mxu1 }
0x106c   : > { %v1829_v0 = vpack.c.bf16 %v1823_v62, %v1823_v62 }
0x106d   : > { %v2535_v2 = vpop.f32.mrf.mxu1 }
0x106e   : > { %2542 = vmatmul.mubr.msk.bf16.vlgmr.msra.gmra.mxu0 %vm915_vm3, %v1829_v0 }
0x106f   : > { %v1826_v4 = vpop.f32.mrf.mxu1  ;;  %2569 = vmatprep.mubr.msk.bf16.mxu0 %vm2744_vm1, %v2743_v19  ;;  %2554 = vmatpush3.bf16.msra.mxu0 %v2650_v26 }
0x1070   : > { %2555 = vmatprep.subr.bf16.mxu0 %v2743_v19 }
0x1071   : > { %v2536_v5 = vpop.f32.mrf.mxu1 }
0x1073   : > { %2556 = vmatpush3.bf16.msra.mxu0 %v2651_v34 }
0x1074   : > { %2557 = vmatprep.subr.bf16.mxu0 %v2743_v19 }
0x1077   : > { %2558 = vmatpush3.bf16.msra.mxu0 %v2652_v27 }
0x1078   : > { %2559 = vmatprep.subr.bf16.mxu0 %v2743_v19 }
0x107b   : > { %2560 = vmatpush3.bf16.msra.mxu0 %v2653_v28 }
0x107c   : > { %2561 = vmatprep.subr.bf16.mxu0 %v2743_v19 }
0x107f   : > { %2562 = vmatpush3.bf16.msra.mxu0 %v2654_v29 }
0x1080   : > { %2563 = vmatprep.subr.bf16.mxu0 %v2743_v19 }
0x1083   : > { %2564 = vmatpush3.bf16.msra.mxu0 %v2655_v35 }
0x1084   : > { %2565 = vmatprep.subr.bf16.mxu0 %v2743_v19 }
0x1087   : > { %2566 = vmatpush3.bf16.msra.mxu0 %v2656_v58 }
0x1088   : > { %2567 = vmatprep.subr.bf16.mxu0 %v2743_v19 }
0x108b   : > { %2568 = vmatpush3.bf16.msra.mxu0 %v2657_v60 }
0x112e   : > { %v1892_v7 = vpop.f32.mrf.mxu0 }
0x112f   : > { %v1893_v8 = vadd.f32 %v2314_v6, %v1892_v7 }
0x1130   : > { %v2543_v9 = vpop.f32.mrf.mxu0 }
0x1131   : > { %v3250_v63 = vadd.f32 %v1893_v8, %v3173_v55  ;;  %v2649_v55 = vld [vmem:[%s3366_s15 + $0x10] sm:$0xff]   ;;  %v2357_v8 = vld [vmem:[%s3370_s19] ss:$0 sm:$0xff] }
0x1132   : > { %v1895_v10 = vpop.f32.mrf.mxu0  ;;  %2548 = vmatpush3.bf16.msra.mxu1 %v2649_v55 }
0x1133   : > { %v1903_v32 = vsel %vm915_vm3, %v3250_v63, 0.0 }
0x1134   : > { %1904 = vadd.xlane.f32.xlu0 %v1903_v32  ;;  %v2544_v11 = vpop.f32.mrf.mxu0 }
0x11bd   : > { %v1905_v12 = vpop.xlane.xlu0 %1904 }
0x11be   : > { %v1906_v13 = vmul.f32 0.03125, %v1905_v12 }
0x11c0   : > { %v1907_v14 = vsub.f32 %v3250_v63, %v1906_v13 }
0x11c2   : > { %v1908_v15 = vmul.f32 %v1907_v14, %v1907_v14 }
0x11c4   : > { %v1909_v16 = vsel %vm915_vm3, %v1908_v15, 0.0 }
0x11c5   : > { %1910 = vadd.xlane.f32.xlu1 %v1909_v16 }
0x124e   : > { %v1911_v18 = vpop.xlane.xlu1 %1910 }
0x124f   : > { %v1912_v30 = vmul.f32 0.03125, %v1911_v18 }
0x1251   : > { %v1913_v20 = vadd.f32 1e-06, %v1912_v30 }
0x1253   : > { %2674 = vrsqrt.f32 %v1913_v20 }
0x1260   : > { %v2675_v21 = vpop.eup %2674 }
0x1261   : > { %v1915_v23 = vmul.f32 %v2675_v21, %v1907_v14 }
0x1263   : > { %v1922_v24 = vmul.f32 %v2320_v22, %v1915_v23 }
0x1265   : > { %v1929_v33 = vadd.f32 %v2321_v31, %v1922_v24 }
0x1267   : > { %v1930_v25 = vpack.c.bf16 %v1929_v33, %v1929_v33 }
0x1269   : > { %2550 = vmatmul.mubr.msk.bf16.vlgmr.msra.gmra.mxu1 %vm915_vm3, %v1930_v25 }
0x1329   : > { %v1993_v1 = vpop.f32.mrf.mxu1 }
0x132a   : > { %v1994_v57 = vadd.f32 %v2327_v56, %v1993_v1 }
0x132b   : > { %v2551_v59 = vpop.f32.mrf.mxu1 }
0x132c   : > { %v1999_v36 = vmul.f32 %v1994_v57, %v1994_v57 }
0x132d   : > { %v1996_v61 = vpop.f32.mrf.mxu1 }
0x132e   : > { %v2000_v37 = vmul.f32 %v1999_v36, %v1994_v57 }
0x132f   : > { %v2552_v3 = vpop.f32.mrf.mxu1 }
0x1330   : > { %v2001_v38 = vmul.f32 0.044715, %v2000_v37 }
0x1332   : > { %v2002_v39 = vadd.f32 %v2001_v38, %v1994_v57 }
0x1334   : > { %v2003_v40 = vmul.f32 0.7978846, %v2002_v39 }
0x1336   : > { %2676 = vtanh.f32 %v2003_v40 }
0x1343   : > { %v2677_v41 = vpop.eup %2676 }
0x1344   : > { %v2005_v42 = vadd.f32 1.0, %v2677_v41 }
0x1346   : > { %v2006_v43 = vmul.f32 0.5, %v2005_v42 }
0x1348   : > { %v2007_v19 = vmul.f32 %v2006_v43, %v1994_v57 }
0x134a   : > { %v2008_v44 = vpack.c.bf16 %v2007_v19, %v2007_v19 }
0x134c   : > { %2570 = vmatmul.mubr.bf16.vlgmr.msra.gmra.mxu0 %v2008_v44 }
0x140c   : > { %v2116_v46 = vpop.f32.mrf.mxu0 }
0x140d   : > { %v2117_v47 = vadd.f32 %v2348_v45, %v2116_v46 }
0x140e   : > { %v2571_v48 = vpop.f32.mrf.mxu0 }
0x140f   : > { %v2122_v49 = vadd.f32 %v2117_v47, %v3250_v63  ;;  %v2358_v63 = vld [vmem:[%s3371_s20] ss:$0 sm:$0xff] }
0x1410   : > { %v2119_v50 = vpop.f32.mrf.mxu0 }
0x1411   : > { %v2125_v51 = vsel %vm915_vm3, %v2122_v49, 0.0 }
0x1412   : > { %2126 = vadd.xlane.f32.xlu1 %v2125_v51  ;;  %v2572_v52 = vpop.f32.mrf.mxu0 }
0x149b   : > { %v2127_v53 = vpop.xlane.xlu1 %2126 }
0x149c   : > { %v2128_v54 = vmul.f32 0.03125, %v2127_v53 }
0x149e   : > { %v2129_v62 = vsub.f32 %v2122_v49, %v2128_v54 }
0x14a0   : > { %v2130_v0 = vmul.f32 %v2129_v62, %v2129_v62 }
0x14a2   : > { %v2131_v2 = vsel %vm915_vm3, %v2130_v0, 0.0 }
0x14a3   : > { %2132 = vadd.xlane.f32.xlu1 %v2131_v2 }
0x152c   : > { %v2133_v4 = vpop.xlane.xlu1 %2132 }
0x152d   : > { %v2134_v5 = vmul.f32 0.03125, %v2133_v4 }
0x152f   : > { %v2135_v6 = vadd.f32 1e-06, %v2134_v5 }
0x1531   : > { %2678 = vrsqrt.f32 %v2135_v6 }
0x153e   : > { %v2679_v7 = vpop.eup %2678 }
0x153f   : > { %v2137_v9 = vmul.f32 %v2679_v7, %v2129_v62 }
0x1541   : > { %v2144_v10 = vmul.f32 %v2357_v8, %v2137_v9 }
0x1543   : > { %v2151_v32 = vadd.f32 %v2358_v63, %v2144_v10 }
0x1545   : > { %v2152_v11 = vsel %vm915_vm3, %v2151_v32, 0.0 }
0x1546   : > { %v2153_v12 = vrot.slane %v2152_v11, 4 }
0x1548   : > { %v2154_v13 = vadd.f32 %v2153_v12, %v2152_v11 }
0x154a   : > { %v2155_v14 = vrot.slane %v2154_v13, 2 }
0x154c   : > { %v2156_v15 = vadd.f32 %v2155_v14, %v2154_v13 }
0x154e   : > { %v2157_v16 = vrot.slane %v2156_v15, 1 }
0x1550   : > { %v2158_v17 = vadd.f32 %v2157_v16, %v2156_v15 }
0x1552   : > { %v2160_v55 = vmul.f32 0.125, %v2158_v17 }
0x1554   : > { %2162 = vst.msk [vmem:[%s661_s27] sm:$0x1] %vm2161_vm4, %v2160_v55 }
0x1555   : > { %2693 = shalt.err (!%p2690_p3)
}
0x1556   : > { %s2694_s7 = scalar_lea.hbm %s2174_s28, 16  ;;  %s2698_s27 = scalar_lea.hbm %s3412_s1, 32 }
0x1557   : > { %p2695_p4 = scmp.ne.s32.totalorder %s2174_s28, %s2694_s7  ;;  %p2699_p9 = scmp.lt.s32.totalorder %s2174_s28, %s3412_s1 }
0x1558   : > { %p2700_p10 = scmp.lt.s32.totalorder %s2698_s27, %s2694_s7 }
0x1559   : > { %p2696_p7 = pnand %p2695_p4, %p2897_p5 }
0x155a   : > { %p2701_p11 = por %p2700_p10, %p2699_p9 }
0x155b   : > { %p2697_p8 = pneg %p2696_p7 }
0x155d   : > { %p2702_p12 = pnand %p2701_p11, %p2697_p8 }
0x155f   : > { %2705 = shalt.err (!%p2702_p12)
}
0x1560   : > { %2573 = dma.vmem_to_hbm [thread:$0]  (%p2897_p5), %s2177_s0, 16, %s2174_s28, %s2164_s21  }
0x1561 PF: > { %s3413_s6 = sld [smem:[#allocation7_spill]] }
0x1562   : > { %s3414_s4 = sld [smem:[#allocation5_spill]] }
0x1567   : > { %p2579_p13 = scmp.ge.s32.totalorder %s3413_s6, 2 }
0x1568   : > { %s2188_s3 = sand.u32 1, %s3414_s4  }
0x1569   : > { %p2576_p0 = pnand %p2579_p13, %p2901_p6  ;;  %s2189_s26 = scalar_lea.sflag [#allocation3], %s2188_s3 }
0x156b   : > { %p2577_p1 = pneg %p2576_p0 }
0x156d   : > { %2723 = dma.done.wait (%p2577_p1), %s2189_s26, 16  }
0x156e   : > { %2725 = vsyncadd (%p2577_p1), %s2189_s26, 4294967280  ;;  %s3416_s27 = sld [smem:[#allocation8_spill]]  ;;  %s3419_s2 = smov %s2732_s25 }
0x156f   : > { %s3417_s7 = sld [smem:[#allocation6_spill]] }
0x1570   : > { %s3418_s26 = sld [smem:[#allocation9_spill]] }
0x1574   : > { %p31_p2 = scmp.ge.s32.totalorder %s3416_s27, 4  }
0x1575   : > { %s3420_s25 = smov %s3417_s7 }
0x1576   :  { %33 = sbr.rel (!%p31_p2) target bundleno = 13 (0xd), region = 154 }
0x157b   :  { %2193 = vsyncpa [#allocation3], 1 }
0x157c   :  { %2195 = vsyncpa [#allocation3 + $0x1], 1 }

</bundles_post_ra>
